<compile_context>
chip_gen: v7x
topology: tpu7x:2x2x1
jax: 0.10.0
libtpu: 0.0.40
codegen_flags: <defaults>
</compile_context>

<pallas_src>
import functools
import math

import jax
import jax.numpy as jnp
from jax.experimental import pallas as pl
from jax.experimental.pallas import tpu as pltpu

VMEM_LIMIT = 48 * 1024 * 1024   # > v5e(16)/v6e(32) scoped defaults, < v7x 64 MiB


# ---------------------------------------------------------------------------
# Helpers
# ---------------------------------------------------------------------------

def _round_up(x, m):
    return ((x + m - 1) // m) * m


def _pick_tile(dim, target, align):
    """Largest tile <= target that is a multiple of `align` and divides `dim`;
    falls back to the full dim (always a legal block).  Dims that could be
    huge AND indivisible (vocab) are padded by the caller before reaching
    this fallback."""
    if dim <= target:
        return dim
    t = (min(target, dim) // align) * align
    while t >= align:
        if dim % t == 0:
            return t
        t -= align
    return dim


def _cparams(semantics, vmem=None):
    kw = {"dimension_semantics": semantics}
    if vmem is not None:
        kw["vmem_limit_bytes"] = vmem
    return pltpu.CompilerParams(**kw)


# ---------------------------------------------------------------------------
# Fused matmul kernel: [LayerNorm prologue] -> matmul -> [bias/GELU/DyT/residual]
# ---------------------------------------------------------------------------

def _matmul_kernel(*refs, nk, activation, has_bias, has_ln, ln_eps,
                   dyt_mode, has_residual):
    idx = 0
    x_ref = refs[idx]; idx += 1
    w_ref = refs[idx]; idx += 1
    if has_ln:
        lng_ref, lnb_ref = refs[idx], refs[idx + 1]; idx += 2
    if has_bias:
        b_ref = refs[idx]; idx += 1
    if dyt_mode is not None:
        a_ref, dg_ref, db_ref = refs[idx], refs[idx + 1], refs[idx + 2]; idx += 3
    if has_residual:
        res_ref = refs[idx]; idx += 1
    o_ref = refs[idx]; idx += 1
    acc_ref = refs[idx] if nk > 1 else None

    x = x_ref[...]                                      # (tm, tk) bf16
    if has_ln:
        # LayerNorm prologue (requires tk == K so the whole row is present).
        xf = x.astype(jnp.float32)
        mu = jnp.mean(xf, axis=-1, keepdims=True)
        var = jnp.mean(jnp.square(xf - mu), axis=-1, keepdims=True)
        xf = (xf - mu) * jax.lax.rsqrt(var + ln_eps)
        xf = xf * lng_ref[...] + lnb_ref[...]
        x = xf.astype(x_ref.dtype)                      # back to bf16 for MXU

    part = jnp.dot(x, w_ref[...], preferred_element_type=jnp.float32)

    def _epilogue(y):                                   # y: (tm, tn) f32
        if has_bias:
            y = y + b_ref[...]
        if activation == "gelu_tanh":
            # GPT2 "gelu_new".
            # TODO(synk): decoder-MLP nn.GELU() is exact erf-GELU; approximated
            # with tanh-GELU (no guaranteed erf lowering in Mosaic).
            c = 0.7978845608028654                      # sqrt(2/pi)
            y = 0.5 * y * (1.0 + jnp.tanh(c * (y + 0.044715 * y * y * y)))
        if has_residual and dyt_mode == "after_residual":
            y = y + res_ref[...].astype(jnp.float32)
        if dyt_mode is not None:                        # gamma*tanh(alpha*x)+beta
            y = dg_ref[...] * jnp.tanh(a_ref[0, 0] * y) + db_ref[...]
        if has_residual and dyt_mode != "after_residual":
            y = y + res_ref[...].astype(jnp.float32)
        o_ref[...] = y.astype(o_ref.dtype)

    if nk == 1:
        # Single K step: no accumulator traffic at all.
        _epilogue(part)
    else:
        k = pl.program_id(2)

        @pl.when(k == 0)
        def _():
            acc_ref[...] = part                          # no zero-init RMW

        @pl.when(jnp.logical_and(k > 0, k < nk - 1))
        def _():
            acc_ref[...] += part

        @pl.when(k == nk - 1)
        def _():
            _epilogue(acc_ref[...] + part)               # last partial stays local


def linear(x2d, w, b=None, *, activation=None, residual=None, ln_params=None,
           ln_eps=1e-5, dyt_params=None, dyt_mode=None,
           out_dtype=jnp.bfloat16, tm=256, tn=1024, tk=2048):
    """y = epilogue(matmul(prologue(x2d), w) ...).  x2d: (M,K) bf16, w: (K,N) bf16."""
    M, K = x2d.shape
    N = w.shape[1]
    tm = _pick_tile(M, tm, 8)
    tn = _pick_tile(N, tn, 128)
    tk = K if ln_params is not None else _pick_tile(K, tk, 128)
    # v7x has 2 TensorCores: give the parallel (i, j) grid >=2 blocks when
    # cheap (one extra ~0.35us step on single-core v5e/v6e).
    if (M // tm) * (N // tn) == 1 and tm % 16 == 0:
        tm //= 2
    grid = (M // tm, N // tn, K // tk)
    nk = grid[2]

    in_specs = [pl.BlockSpec((tm, tk), lambda i, j, k: (i, k)),
                pl.BlockSpec((tk, tn), lambda i, j, k: (k, j))]
    operands = [x2d, w]

    has_ln = ln_params is not None
    if has_ln:
        assert tk == K, "LayerNorm prologue fusion needs full rows (tk == K)"
        lng, lnb = ln_params
        in_specs += [pl.BlockSpec((1, K), lambda i, j, k: (0, 0)),
                     pl.BlockSpec((1, K), lambda i, j, k: (0, 0))]
        operands += [lng, lnb]

    has_bias = b is not None
    if has_bias:
        in_specs.append(pl.BlockSpec((1, tn), lambda i, j, k: (0, j)))
        operands.append(b)

    if dyt_params is not None:
        alpha, dg, db = dyt_params
        in_specs.append(pl.BlockSpec(memory_space=pltpu.MemorySpace.SMEM))
        in_specs.append(pl.BlockSpec((1, tn), lambda i, j, k: (0, j)))
        in_specs.append(pl.BlockSpec((1, tn), lambda i, j, k: (0, j)))
        operands += [alpha, dg, db]

    has_residual = residual is not None
    if has_residual:
        in_specs.append(pl.BlockSpec((tm, tn), lambda i, j, k: (i, j)))
        operands.append(residual)

    kernel = functools.partial(
        _matmul_kernel, nk=nk, activation=activation, has_bias=has_bias,
        has_ln=has_ln, ln_eps=ln_eps,
        dyt_mode=(dyt_mode if dyt_params is not None else None),
        has_residual=has_residual)

    return pl.pallas_call(
        kernel,
        out_shape=jax.ShapeDtypeStruct((M, N), out_dtype),
        grid=grid,
        in_specs=in_specs,
        out_specs=pl.BlockSpec((tm, tn), lambda i, j, k: (i, j)),
        scratch_shapes=([pltpu.VMEM((tm, tn), jnp.float32)] if nk > 1 else []),
        compiler_params=_cparams(("parallel", "parallel", "arbitrary"),
                                 VMEM_LIMIT),
    )(*operands)


# ---------------------------------------------------------------------------
# Standalone LayerNorm (only for ln_f: its output feeds BOTH the cross-attn
# query projection and the cross-attn residual, so it must be materialized).
# ---------------------------------------------------------------------------

def _layernorm_kernel(x_ref, g_ref, b_ref, o_ref, *, eps):
    x = x_ref[...].astype(jnp.float32)
    mu = jnp.mean(x, axis=-1, keepdims=True)
    var = jnp.mean(jnp.square(x - mu), axis=-1, keepdims=True)
    y = (x - mu) * jax.lax.rsqrt(var + eps)
    o_ref[...] = (y * g_ref[...] + b_ref[...]).astype(o_ref.dtype)


def layernorm(x2d, gamma, beta, eps=1e-5, tm=512):
    M, H = x2d.shape
    tm = _pick_tile(M, tm, 8)
    if M // tm == 1 and tm % 16 == 0:
        tm //= 2
    return pl.pallas_call(
        functools.partial(_layernorm_kernel, eps=eps),
        out_shape=jax.ShapeDtypeStruct((M, H), jnp.bfloat16),
        grid=(M // tm,),
        in_specs=[pl.BlockSpec((tm, H), lambda i: (i, 0)),
                  pl.BlockSpec((1, H), lambda i: (0, 0)),
                  pl.BlockSpec((1, H), lambda i: (0, 0))],
        out_specs=pl.BlockSpec((tm, H), lambda i: (i, 0)),
        compiler_params=_cparams(("parallel",)),
    )(x2d, gamma, beta)


# ---------------------------------------------------------------------------
# Flash attention: grid over (batch, head, q-tile, kv-tile), bf16 MXU inputs,
# running max/sum online softmax, causal skip of fully-masked KV tiles.
# ---------------------------------------------------------------------------

def _flash_attn_kernel(q_ref, k_ref, v_ref, o_ref, m_ref, l_ref, acc_ref, *,
                       scale, causal):
    qi = pl.program_id(2)
    ki = pl.program_id(3)
    tq = q_ref.shape[2]
    tk = k_ref.shape[2]

    @pl.when(ki == 0)
    def _():
        m_ref[...] = jnp.full_like(m_ref, -1e30)
        l_ref[...] = jnp.zeros_like(l_ref)
        acc_ref[...] = jnp.zeros_like(acc_ref)

    def _attend():
        q = q_ref[0, 0]                                   # (tq, dh) bf16
        k = k_ref[0, 0]                                   # (tk, dh) bf16
        s = jax.lax.dot_general(q, k, (((1,), (1,)), ((), ())),
                                preferred_element_type=jnp.float32) * scale
        if causal:
            row = qi * tq + jax.lax.broadcasted_iota(jnp.int32, (tq, tk), 0)
            col = ki * tk + jax.lax.broadcasted_iota(jnp.int32, (tq, tk), 1)
            s = jnp.where(row >= col, s, -1e30)
        m_prev = m_ref[...]
        m_new = jnp.maximum(m_prev, jnp.max(s, axis=-1, keepdims=True))
        alpha = jnp.exp(m_prev - m_new)
        p = jnp.exp(s - m_new)
        l_ref[...] = alpha * l_ref[...] + jnp.sum(p, axis=-1, keepdims=True)
        acc_ref[...] = alpha * acc_ref[...] + jnp.dot(
            p.astype(v_ref.dtype), v_ref[0, 0],
            preferred_element_type=jnp.float32)
        m_ref[...] = m_new

    if causal:
        # Skip KV tiles that lie entirely above the causal diagonal.
        @pl.when(qi * tq + (tq - 1) >= ki * tk)
        def _():
            _attend()
    else:
        _attend()

    @pl.when(ki == pl.num_programs(3) - 1)
    def _():
        o_ref[0, 0] = (acc_ref[...] *
                       pl.reciprocal(l_ref[...], approx=True)).astype(o_ref.dtype)


def flash_attention(q, k, v, *, scale, causal, tq=256, tkv=256):
    """q: (B, nh, Sq, dh), k/v: (B, nh, Sk, dh) bf16 -> (B, nh, Sq, dh) bf16."""
    B, nh, Sq, dh = q.shape
    Sk = k.shape[2]
    tq = _pick_tile(Sq, tq, 8)
    tkv = _pick_tile(Sk, tkv, 8)
    grid = (B, nh, Sq // tq, Sk // tkv)
    return pl.pallas_call(
        functools.partial(_flash_attn_kernel, scale=scale, causal=causal),
        out_shape=jax.ShapeDtypeStruct((B, nh, Sq, dh), jnp.bfloat16),
        grid=grid,
        in_specs=[pl.BlockSpec((1, 1, tq, dh), lambda b, h, i, j: (b, h, i, 0)),
                  pl.BlockSpec((1, 1, tkv, dh), lambda b, h, i, j: (b, h, j, 0)),
                  pl.BlockSpec((1, 1, tkv, dh), lambda b, h, i, j: (b, h, j, 0))],
        out_specs=pl.BlockSpec((1, 1, tq, dh), lambda b, h, i, j: (b, h, i, 0)),
        scratch_shapes=[pltpu.VMEM((tq, 1), jnp.float32),
                        pltpu.VMEM((tq, 1), jnp.float32),
                        pltpu.VMEM((tq, dh), jnp.float32)],
        compiler_params=_cparams(
            ("parallel", "parallel", "parallel", "arbitrary"), VMEM_LIMIT),
    )(q, k, v)


# ---------------------------------------------------------------------------
# Parameters (deterministic synthetic).  Weights bf16 (MXU); norm/DyT params
# and biases f32.
# ---------------------------------------------------------------------------

def init_params(key, *, H, n_head, vocab, n_pos, n_layer):
    keys = iter(jax.random.split(key, 64))

    def randn(shape, std=0.02):
        return (std * jax.random.normal(next(keys), shape, jnp.float32)
                ).astype(jnp.bfloat16)

    def zeros_b(n):
        return jnp.zeros((1, n), jnp.float32)

    p = {"n_head": n_head, "vocab": vocab}
    p["wte"] = randn((vocab, H))                    # token embedding (tied)
    p["wpe"] = randn((n_pos, H), 0.01)

    layers = []
    for _ in range(n_layer):
        layers.append(dict(
            ln1_g=jnp.ones((1, H), jnp.float32), ln1_b=jnp.zeros((1, H), jnp.float32),
            attn_w=randn((H, 3 * H)), attn_b=zeros_b(3 * H),
            attn_proj_w=randn((H, H)), attn_proj_b=zeros_b(H),
            ln2_g=jnp.ones((1, H), jnp.float32), ln2_b=jnp.zeros((1, H), jnp.float32),
            fc_w=randn((H, 4 * H)), fc_b=zeros_b(4 * H),
            proj_w=randn((4 * H, H)), proj_b=zeros_b(H),
        ))
    p["layers"] = layers
    p["lnf_g"] = jnp.ones((1, H), jnp.float32)
    p["lnf_b"] = jnp.zeros((1, H), jnp.float32)

    # Cross attention (nn.MultiheadAttention, batch_first); k/v projections packed.
    p["ca_wq"] = randn((H, H)); p["ca_bq"] = zeros_b(H)
    wk = randn((H, H)); wv = randn((H, H))
    p["ca_wkv"] = jnp.concatenate([wk, wv], axis=1)       # (H, 2H)
    p["ca_bkv"] = zeros_b(2 * H)
    p["ca_wo"] = randn((H, H)); p["ca_bo"] = zeros_b(H)

    # Single shared DyT module (applied twice, exactly as the reference does).
    p["dyt_alpha"] = jnp.full((1, 1), 0.5, jnp.float32)    # SMEM scalar
    p["dyt_g"] = jnp.ones((1, H), jnp.float32)
    p["dyt_b"] = jnp.zeros((1, H), jnp.float32)

    # Decoder MLP.
    p["mlp_w1"] = randn((H, 4 * H)); p["mlp_b1"] = zeros_b(4 * H)
    p["mlp_w2"] = randn((4 * H, H)); p["mlp_b2"] = zeros_b(H)

    # Tied LM head: one-time pre-transposed (H, vocab_pad) bf16 copy with the
    # vocab padded to a 128-lane multiple (avoids the _pick_tile full-dim
    # fallback at vocab=50257 and any per-tile XLU transpose).
    vocab_pad = _round_up(vocab, 128)
    wT = p["wte"].T
    p["lm_head_wT"] = jnp.pad(wT, ((0, 0), (0, vocab_pad - vocab)))
    return p


# ---------------------------------------------------------------------------
# Forward pass (layout glue in plain JAX, hot paths in Pallas kernels)
# ---------------------------------------------------------------------------

def p2decoder_forward(params, x_ids, encoder_output):
    B, S = x_ids.shape
    Se = encoder_output.shape[1]
    H = params["wte"].shape[1]
    nh = params["n_head"]
    dh = H // nh
    scale = 1.0 / math.sqrt(dh)
    dyt = (params["dyt_alpha"], params["dyt_g"], params["dyt_b"])

    # --- GPT2 embeddings (gather = glue); dropout is eval-mode identity ------
    h = (params["wte"][x_ids].astype(jnp.float32)
         + params["wpe"][:S][None, :, :].astype(jnp.float32))
    h2d = h.astype(jnp.bfloat16).reshape(B * S, H)

    # --- GPT2 transformer layers ---------------------------------------------
    for lp in params["layers"]:
        # ln_1 fused into the QKV projection prologue.
        qkv = linear(h2d, lp["attn_w"], lp["attn_b"],
                     ln_params=(lp["ln1_g"], lp["ln1_b"]))
        qkv = qkv.reshape(B, S, 3, nh, dh).transpose(2, 0, 3, 1, 4)  # (3,B,nh,S,dh)
        attn = flash_attention(qkv[0], qkv[1], qkv[2], scale=scale, causal=True)
        attn = attn.transpose(0, 2, 1, 3).reshape(B * S, H)
        # attn out-proj fused with residual add.
        h2d = linear(attn, lp["attn_proj_w"], lp["attn_proj_b"], residual=h2d)

        # ln_2 fused into the MLP fc prologue; GELU (gelu_new) in the epilogue.
        m = linear(h2d, lp["fc_w"], lp["fc_b"], activation="gelu_tanh",
                   ln_params=(lp["ln2_g"], lp["ln2_b"]))
        # MLP out-proj fused with residual add.
        h2d = linear(m, lp["proj_w"], lp["proj_b"], residual=h2d)

    # ln_f stays standalone: its output is both the CA query input and the
    # residual operand of the CA out-projection.
    h2d = layernorm(h2d, params["lnf_g"], params["lnf_b"])

    # --- cross attention (decoder attends to encoder) + residual + DyT --------
    q = linear(h2d, params["ca_wq"], params["ca_bq"])
    q = q.reshape(B, S, nh, dh).transpose(0, 2, 1, 3)                # (B,nh,S,dh)
    enc2d = encoder_output.astype(jnp.bfloat16).reshape(B * Se, H)
    kv = linear(enc2d, params["ca_wkv"], params["ca_bkv"])
    kv = kv.reshape(B, Se, 2, nh, dh).transpose(2, 0, 3, 1, 4)       # (2,B,nh,Se,dh)
    ca = flash_attention(q, kv[0], kv[1], scale=scale, causal=False)
    ca = ca.transpose(0, 2, 1, 3).reshape(B * S, H)
    # o-proj + residual(h2d) + DyT fused:  h_n = DyT(cross_attn(x) + x)
    h_n = linear(ca, params["ca_wo"], params["ca_bo"],
                 residual=h2d, dyt_params=dyt, dyt_mode="after_residual")

    # --- decoder MLP; second linear fuses DyT then residual:  DyT(mlp(x)) + x --
    m = linear(h_n, params["mlp_w1"], params["mlp_b1"], activation="gelu_tanh")
    out = linear(m, params["mlp_w2"], params["mlp_b2"],
                 residual=h_n, dyt_params=dyt, dyt_mode="before_residual")

    # --- LM head (tied, bias-free, pre-transposed + vocab-padded weight) ------
    # TODO(synk): f32 logits kept for reference parity; bf16 (or fusing the
    # downstream softmax/loss) would halve the largest HBM write.
    logits = linear(out, params["lm_head_wT"], None, out_dtype=jnp.float32)
    logits = logits[:, :params["vocab"]]
    return logits.reshape(B, S, params["vocab"])


# ---------------------------------------------------------------------------

if __name__ == "__main__":
    B, S, Se = 2, 8, 16           # batch, decoder seq, encoder seq
    H, n_head = 32, 4             # hidden size, heads (head_dim = 8)
    vocab, n_layer = 64, 2

    key = jax.random.PRNGKey(0)
    kp, kx, ke = jax.random.split(key, 3)

    params = init_params(kp, H=H, n_head=n_head, vocab=vocab, n_pos=32,
                         n_layer=n_layer)
    x_ids = jax.random.randint(kx, (B, S), 0, vocab, jnp.int32)
    encoder_output = jax.random.normal(ke, (B, Se, H), jnp.float32)

    fwd = jax.jit(lambda ids, enc: p2decoder_forward(params, ids, enc))
    logits = jax.block_until_ready(fwd(x_ids, encoder_output))

    assert logits.shape == (B, S, vocab), logits.shape
    assert bool(jnp.all(jnp.isfinite(logits)))
    print("KERNEL_OK")
</pallas_src>

<mosaic_0001>
module attributes {stable_mosaic.version = 11 : i64} {
  func.func @_matmul_kernel(%arg0: i32, %arg1: i32, %arg2: i32, %arg3: memref<8x32xbf16, #tpu.memory_space<vmem>>, %arg4: memref<32x96xbf16, #tpu.memory_space<vmem>>, %arg5: memref<1x32xf32, #tpu.memory_space<vmem>>, %arg6: memref<1x32xf32, #tpu.memory_space<vmem>>, %arg7: memref<1x96xf32, #tpu.memory_space<vmem>>, %arg8: memref<8x96xbf16, #tpu.memory_space<vmem>>) attributes {dimension_semantics = [#tpu.dimension_semantics<parallel>, #tpu.dimension_semantics<parallel>, #tpu.dimension_semantics<arbitrary>], iteration_bounds = array<i64: 2, 1, 1>, scalar_prefetch = 0 : i64, scratch_operands = 0 : i64, tpu.core_type = #tpu.core_type<tc>, window_params = [{transform_indices = @transform_0, window_bounds = array<i64: 8, 32>}, {transform_indices = @transform_1, window_bounds = array<i64: 32, 96>}, {pipeline_mode = #tpu.pipeline_mode<synchronous>, transform_indices = @transform_2, window_bounds = array<i64: 1, 32>}, {pipeline_mode = #tpu.pipeline_mode<synchronous>, transform_indices = @transform_3, window_bounds = array<i64: 1, 32>}, {transform_indices = @transform_4, window_bounds = array<i64: 1, 96>}, {transform_indices = @transform_5, window_bounds = array<i64: 8, 96>}]} {
    %c0 = arith.constant 0 : index
    %c0_0 = arith.constant 0 : index
    %0 = vector.load %arg3[%c0, %c0_0] : memref<8x32xbf16, #tpu.memory_space<vmem>>, vector<8x32xbf16>
    %1 = arith.extf %0 : vector<8x32xbf16> to vector<8x32xf32>
    %cst = arith.constant dense<0.000000e+00> : vector<8xf32>
    %2 = vector.multi_reduction <add>, %1, %cst [1] : vector<8x32xf32> to vector<8xf32>
    %3 = vector.shape_cast %2 : vector<8xf32> to vector<8x1xf32>
    %cst_1 = arith.constant 3.200000e+01 : f32
    %4 = vector.broadcast %cst_1 : f32 to vector<8x1xf32>
    %5 = arith.divf %3, %4 : vector<8x1xf32>
    %6 = vector.broadcast %5 : vector<8x1xf32> to vector<8x32xf32>
    %7 = arith.subf %1, %6 : vector<8x32xf32>
    %8 = arith.mulf %7, %7 : vector<8x32xf32>
    %cst_2 = arith.constant dense<0.000000e+00> : vector<8xf32>
    %9 = vector.multi_reduction <add>, %8, %cst_2 [1] : vector<8x32xf32> to vector<8xf32>
    %10 = vector.shape_cast %9 : vector<8xf32> to vector<8x1xf32>
    %cst_3 = arith.constant 3.200000e+01 : f32
    %11 = vector.broadcast %cst_3 : f32 to vector<8x1xf32>
    %12 = arith.divf %10, %11 : vector<8x1xf32>
    %13 = vector.broadcast %5 : vector<8x1xf32> to vector<8x32xf32>
    %14 = arith.subf %1, %13 : vector<8x32xf32>
    %cst_4 = arith.constant 9.99999974E-6 : f32
    %15 = vector.broadcast %cst_4 : f32 to vector<8x1xf32>
    %16 = arith.addf %12, %15 : vector<8x1xf32>
    %17 = math.rsqrt %16 : vector<8x1xf32>
    %18 = vector.broadcast %17 : vector<8x1xf32> to vector<8x32xf32>
    %19 = arith.mulf %14, %18 : vector<8x32xf32>
    %c0_5 = arith.constant 0 : index
    %c0_6 = arith.constant 0 : index
    %20 = vector.load %arg5[%c0_5, %c0_6] : memref<1x32xf32, #tpu.memory_space<vmem>>, vector<1x32xf32>
    %21 = vector.broadcast %20 : vector<1x32xf32> to vector<8x32xf32>
    %22 = arith.mulf %19, %21 : vector<8x32xf32>
    %c0_7 = arith.constant 0 : index
    %c0_8 = arith.constant 0 : index
    %23 = vector.load %arg6[%c0_7, %c0_8] : memref<1x32xf32, #tpu.memory_space<vmem>>, vector<1x32xf32>
    %24 = vector.broadcast %23 : vector<1x32xf32> to vector<8x32xf32>
    %25 = arith.addf %22, %24 : vector<8x32xf32>
    %26 = arith.truncf %25 : vector<8x32xf32> to vector<8x32xbf16>
    %c0_9 = arith.constant 0 : index
    %c0_10 = arith.constant 0 : index
    %27 = vector.load %arg4[%c0_9, %c0_10] : memref<32x96xbf16, #tpu.memory_space<vmem>>, vector<32x96xbf16>
    %cst_11 = arith.constant dense<0.000000e+00> : vector<8x96xf32>
    %28 = tpu.matmul %26, %27, %cst_11 {dimension_numbers = #tpu.dot_dimension_numbers<[1], [0], [0], [1], [0, 0, 1, 1], [], []>} : vector<8x32xbf16>, vector<32x96xbf16>, vector<8x96xf32> -> vector<8x96xf32>
    %c0_12 = arith.constant 0 : index
    %c0_13 = arith.constant 0 : index
    %29 = vector.load %arg7[%c0_12, %c0_13] : memref<1x96xf32, #tpu.memory_space<vmem>>, vector<1x96xf32>
    %30 = vector.broadcast %29 : vector<1x96xf32> to vector<8x96xf32>
    %31 = arith.addf %28, %30 : vector<8x96xf32>
    %32 = arith.truncf %31 : vector<8x96xf32> to vector<8x96xbf16>
    %c0_14 = arith.constant 0 : index
    %c0_15 = arith.constant 0 : index
    %33 = vector.load %arg8[%c0_14, %c0_15] : memref<8x96xbf16, #tpu.memory_space<vmem>>, vector<8x96xbf16>
    tpu.vector_store %arg8[%c0_14, %c0_15], %32 {strides = array<i32>} : memref<8x96xbf16, #tpu.memory_space<vmem>>, vector<8x96xbf16>,
    return
  }
  func.func @transform_0(%arg0: i32, %arg1: i32, %arg2: i32) -> (i32, i32) {
    %c0_i32 = arith.constant 0 : i32
    return %arg0, %arg2 : i32, i32
  }
  func.func @transform_1(%arg0: i32, %arg1: i32, %arg2: i32) -> (i32, i32) {
    %c0_i32 = arith.constant 0 : i32
    return %arg2, %arg1 : i32, i32
  }
  func.func @transform_2(%arg0: i32, %arg1: i32, %arg2: i32) -> (i32, i32) {
    %c0_i32 = arith.constant 0 : i32
    %c0_i32_0 = arith.constant 0 : i32
    %c0_i32_1 = arith.constant 0 : i32
    return %c0_i32, %c0_i32_0 : i32, i32
  }
  func.func @transform_3(%arg0: i32, %arg1: i32, %arg2: i32) -> (i32, i32) {
    %c0_i32 = arith.constant 0 : i32
    %c0_i32_0 = arith.constant 0 : i32
    %c0_i32_1 = arith.constant 0 : i32
    return %c0_i32, %c0_i32_0 : i32, i32
  }
  func.func @transform_4(%arg0: i32, %arg1: i32, %arg2: i32) -> (i32, i32) {
    %c0_i32 = arith.constant 0 : i32
    %c0_i32_0 = arith.constant 0 : i32
    return %c0_i32, %arg1 : i32, i32
  }
  func.func @transform_5(%arg0: i32, %arg1: i32, %arg2: i32) -> (i32, i32) {
    %c0_i32 = arith.constant 0 : i32
    return %arg0, %arg1 : i32, i32
  }
}

module attributes {stable_mosaic.version = 11 : i64} {
  func.func @_flash_attn_kernel(%arg0: i32, %arg1: i32, %arg2: i32, %arg3: i32, %arg4: memref<1x1x8x8xbf16, #tpu.memory_space<vmem>>, %arg5: memref<1x1x8x8xbf16, #tpu.memory_space<vmem>>, %arg6: memref<1x1x8x8xbf16, #tpu.memory_space<vmem>>, %arg7: memref<1x1x8x8xbf16, #tpu.memory_space<vmem>>, %arg8: memref<8x1xf32, #tpu.memory_space<vmem>>, %arg9: memref<8x1xf32, #tpu.memory_space<vmem>>, %arg10: memref<8x8xf32, #tpu.memory_space<vmem>>) attributes {dimension_semantics = [#tpu.dimension_semantics<parallel>, #tpu.dimension_semantics<parallel>, #tpu.dimension_semantics<parallel>, #tpu.dimension_semantics<arbitrary>], iteration_bounds = array<i64: 2, 4, 1, 1>, scalar_prefetch = 0 : i64, scratch_operands = 3 : i64, tpu.core_type = #tpu.core_type<tc>, window_params = [{transform_indices = @transform_0, window_bounds = array<i64: 1, 1, 8, 8>}, {transform_indices = @transform_1, window_bounds = array<i64: 1, 1, 8, 8>}, {transform_indices = @transform_2, window_bounds = array<i64: 1, 1, 8, 8>}, {transform_indices = @transform_3, window_bounds = array<i64: 1, 1, 8, 8>}]} {
    %c0_i32 = arith.constant 0 : i32
    %0 = arith.cmpi eq, %arg3, %c0_i32 : i32
    %1 = arith.extui %0 : i1 to i32
    %c0_i32_0 = arith.constant 0 : i32
    %2 = arith.cmpi ne, %1, %c0_i32_0 : i32
    scf.if %2 {
      %cst = arith.constant -1.000000e+30 : f32
      %12 = vector.broadcast %cst : f32 to vector<8x1xf32>
      %c0 = arith.constant 0 : index
      %c0_5 = arith.constant 0 : index
      %13 = vector.load %arg8[%c0, %c0_5] : memref<8x1xf32, #tpu.memory_space<vmem>>, vector<8x1xf32>
      tpu.vector_store %arg8[%c0, %c0_5], %12 {strides = array<i32>} : memref<8x1xf32, #tpu.memory_space<vmem>>, vector<8x1xf32>,
      %cst_6 = arith.constant 0.000000e+00 : f32
      %14 = vector.broadcast %cst_6 : f32 to vector<8x1xf32>
      %c0_7 = arith.constant 0 : index
      %c0_8 = arith.constant 0 : index
      %15 = vector.load %arg9[%c0_7, %c0_8] : memref<8x1xf32, #tpu.memory_space<vmem>>, vector<8x1xf32>
      tpu.vector_store %arg9[%c0_7, %c0_8], %14 {strides = array<i32>} : memref<8x1xf32, #tpu.memory_space<vmem>>, vector<8x1xf32>,
      %cst_9 = arith.constant 0.000000e+00 : f32
      %16 = vector.broadcast %cst_9 : f32 to vector<8x8xf32>
      %c0_10 = arith.constant 0 : index
      %c0_11 = arith.constant 0 : index
      %17 = vector.load %arg10[%c0_10, %c0_11] : memref<8x8xf32, #tpu.memory_space<vmem>>, vector<8x8xf32>
      tpu.vector_store %arg10[%c0_10, %c0_11], %16 {strides = array<i32>} : memref<8x8xf32, #tpu.memory_space<vmem>>, vector<8x8xf32>,
    } else {
    }
    %c8_i32 = arith.constant 8 : i32
    %3 = arith.muli %arg2, %c8_i32 : i32
    %c7_i32 = arith.constant 7 : i32
    %4 = arith.addi %3, %c7_i32 : i32
    %c8_i32_1 = arith.constant 8 : i32
    %5 = arith.muli %arg3, %c8_i32_1 : i32
    %6 = arith.cmpi sge, %4, %5 : i32
    %7 = arith.extui %6 : i1 to i32
    %c0_i32_2 = arith.constant 0 : i32
    %8 = arith.cmpi ne, %7, %c0_i32_2 : i32
    scf.if %8 {
      %c0 = arith.constant 0 : index
      %c0_5 = arith.constant 0 : index
      %c0_6 = arith.constant 0 : index
      %c0_7 = arith.constant 0 : index
      %12 = vector.load %arg4[%c0, %c0_5, %c0_6, %c0_7] : memref<1x1x8x8xbf16, #tpu.memory_space<vmem>>, vector<1x1x8x8xbf16>
      %13 = vector.shape_cast %12 : vector<1x1x8x8xbf16> to vector<8x8xbf16>
      %c0_8 = arith.constant 0 : index
      %c0_9 = arith.constant 0 : index
      %c0_10 = arith.constant 0 : index
      %c0_11 = arith.constant 0 : index
      %14 = vector.load %arg5[%c0_8, %c0_9, %c0_10, %c0_11] : memref<1x1x8x8xbf16, #tpu.memory_space<vmem>>, vector<1x1x8x8xbf16>
      %15 = vector.shape_cast %14 : vector<1x1x8x8xbf16> to vector<8x8xbf16>
      %cst = arith.constant dense<0.000000e+00> : vector<8x8xf32>
      %16 = tpu.matmul %13, %15, %cst {dimension_numbers = #tpu.dot_dimension_numbers<[1], [1], [0], [0], [0, 0, 1, 0], [], []>} : vector<8x8xbf16>, vector<8x8xbf16>, vector<8x8xf32> -> vector<8x8xf32>
      %cst_12 = arith.constant 0.353553385 : f32
      %17 = vector.broadcast %cst_12 : f32 to vector<8x8xf32>
      %18 = arith.mulf %16, %17 : vector<8x8xf32>
      %c8_i32_13 = arith.constant 8 : i32
      %19 = arith.muli %arg2, %c8_i32_13 : i32
      %20 = tpu.iota {dimensions = array<i32: 0>} : vector<8x8xi32>
      %21 = vector.broadcast %19 : i32 to vector<8x8xi32>
      %22 = arith.addi %21, %20 : vector<8x8xi32>
      %c8_i32_14 = arith.constant 8 : i32
      %23 = arith.muli %arg3, %c8_i32_14 : i32
      %24 = tpu.iota {dimensions = array<i32: 1>} : vector<8x8xi32>
      %25 = vector.broadcast %23 : i32 to vector<8x8xi32>
      %26 = arith.addi %25, %24 : vector<8x8xi32>
      %27 = arith.cmpi sge, %22, %26 : vector<8x8xi32>
      %cst_15 = arith.constant -1.000000e+30 : f32
      %28 = vector.broadcast %cst_15 : f32 to vector<8x8xf32>
      %29 = arith.select %27, %18, %28 : vector<8x8xi1>, vector<8x8xf32>
      %c0_16 = arith.constant 0 : index
      %c0_17 = arith.constant 0 : index
      %30 = vector.load %arg8[%c0_16, %c0_17] : memref<8x1xf32, #tpu.memory_space<vmem>>, vector<8x1xf32>
      %cst_18 = arith.constant dense<0xFF800000> : vector<8xf32>
      %31 = vector.multi_reduction <maximumf>, %29, %cst_18 [1] : vector<8x8xf32> to vector<8xf32>
      %32 = vector.shape_cast %31 : vector<8xf32> to vector<8x1xf32>
      %33 = arith.maximumf %30, %32 : vector<8x1xf32>
      %34 = arith.subf %30, %33 : vector<8x1xf32>
      %35 = math.exp %34 : vector<8x1xf32>
      %36 = vector.broadcast %33 : vector<8x1xf32> to vector<8x8xf32>
      %37 = arith.subf %29, %36 : vector<8x8xf32>
      %38 = math.exp %37 : vector<8x8xf32>
      %c0_19 = arith.constant 0 : index
      %c0_20 = arith.constant 0 : index
      %39 = vector.load %arg9[%c0_19, %c0_20] : memref<8x1xf32, #tpu.memory_space<vmem>>, vector<8x1xf32>
      %40 = arith.mulf %35, %39 : vector<8x1xf32>
      %cst_21 = arith.constant dense<0.000000e+00> : vector<8xf32>
      %41 = vector.multi_reduction <add>, %38, %cst_21 [1] : vector<8x8xf32> to vector<8xf32>
      %42 = vector.shape_cast %41 : vector<8xf32> to vector<8x1xf32>
      %43 = arith.addf %40, %42 : vector<8x1xf32>
      %c0_22 = arith.constant 0 : index
      %c0_23 = arith.constant 0 : index
      %44 = vector.load %arg9[%c0_22, %c0_23] : memref<8x1xf32, #tpu.memory_space<vmem>>, vector<8x1xf32>
      tpu.vector_store %arg9[%c0_22, %c0_23], %43 {strides = array<i32>} : memref<8x1xf32, #tpu.memory_space<vmem>>, vector<8x1xf32>,
      %c0_24 = arith.constant 0 : index
      %c0_25 = arith.constant 0 : index
      %45 = vector.load %arg10[%c0_24, %c0_25] : memref<8x8xf32, #tpu.memory_space<vmem>>, vector<8x8xf32>
      %46 = vector.broadcast %35 : vector<8x1xf32> to vector<8x8xf32>
      %47 = arith.mulf %46, %45 : vector<8x8xf32>
      %48 = arith.truncf %38 : vector<8x8xf32> to vector<8x8xbf16>
      %c0_26 = arith.constant 0 : index
      %c0_27 = arith.constant 0 : index
      %c0_28 = arith.constant 0 : index
      %c0_29 = arith.constant 0 : index
      %49 = vector.load %arg6[%c0_26, %c0_27, %c0_28, %c0_29] : memref<1x1x8x8xbf16, #tpu.memory_space<vmem>>, vector<1x1x8x8xbf16>
      %50 = vector.shape_cast %49 : vector<1x1x8x8xbf16> to vector<8x8xbf16>
      %cst_30 = arith.constant dense<0.000000e+00> : vector<8x8xf32>
      %51 = tpu.matmul %48, %50, %cst_30 {dimension_numbers = #tpu.dot_dimension_numbers<[1], [0], [0], [1], [0, 0, 1, 1], [], []>} : vector<8x8xbf16>, vector<8x8xbf16>, vector<8x8xf32> -> vector<8x8xf32>
      %52 = arith.addf %47, %51 : vector<8x8xf32>
      %c0_31 = arith.constant 0 : index
      %c0_32 = arith.constant 0 : index
      %53 = vector.load %arg10[%c0_31, %c0_32] : memref<8x8xf32, #tpu.memory_space<vmem>>, vector<8x8xf32>
      tpu.vector_store %arg10[%c0_31, %c0_32], %52 {strides = array<i32>} : memref<8x8xf32, #tpu.memory_space<vmem>>, vector<8x8xf32>,
      %c0_33 = arith.constant 0 : index
      %c0_34 = arith.constant 0 : index
      %54 = vector.load %arg8[%c0_33, %c0_34] : memref<8x1xf32, #tpu.memory_space<vmem>>, vector<8x1xf32>
      tpu.vector_store %arg8[%c0_33, %c0_34], %33 {strides = array<i32>} : memref<8x1xf32, #tpu.memory_space<vmem>>, vector<8x1xf32>,
    } else {
    }
    %c0_i32_3 = arith.constant 0 : i32
    %9 = arith.cmpi eq, %arg3, %c0_i32_3 : i32
    %10 = arith.extui %9 : i1 to i32
    %c0_i32_4 = arith.constant 0 : i32
    %11 = arith.cmpi ne, %10, %c0_i32_4 : i32
    scf.if %11 {
      %c0 = arith.constant 0 : index
      %c0_5 = arith.constant 0 : index
      %12 = vector.load %arg10[%c0, %c0_5] : memref<8x8xf32, #tpu.memory_space<vmem>>, vector<8x8xf32>
      %c0_6 = arith.constant 0 : index
      %c0_7 = arith.constant 0 : index
      %13 = vector.load %arg9[%c0_6, %c0_7] : memref<8x1xf32, #tpu.memory_space<vmem>>, vector<8x1xf32>
      %14 = tpu.reciprocal %13 {approx = true} : vector<8x1xf32> -> vector<8x1xf32>
      %15 = vector.broadcast %14 : vector<8x1xf32> to vector<8x8xf32>
      %16 = arith.mulf %12, %15 : vector<8x8xf32>
      %17 = arith.truncf %16 : vector<8x8xf32> to vector<8x8xbf16>
      %c0_8 = arith.constant 0 : index
      %c0_9 = arith.constant 0 : index
      %c0_10 = arith.constant 0 : index
      %c0_11 = arith.constant 0 : index
      %18 = vector.load %arg7[%c0_8, %c0_9, %c0_10, %c0_11] : memref<1x1x8x8xbf16, #tpu.memory_space<vmem>>, vector<1x1x8x8xbf16>
      %19 = vector.shape_cast %18 : vector<1x1x8x8xbf16> to vector<8x8xbf16>
      %20 = vector.shape_cast %17 : vector<8x8xbf16> to vector<1x1x8x8xbf16>
      tpu.vector_store %arg7[%c0_8, %c0_9, %c0_10, %c0_11], %20 {strides = array<i32>} : memref<1x1x8x8xbf16, #tpu.memory_space<vmem>>, vector<1x1x8x8xbf16>,
    } else {
    }
    return
  }
  func.func @transform_0(%arg0: i32, %arg1: i32, %arg2: i32, %arg3: i32) -> (i32, i32, i32, i32) {
    %c0_i32 = arith.constant 0 : i32
    %c0_i32_0 = arith.constant 0 : i32
    return %arg0, %arg1, %arg2, %c0_i32 : i32, i32, i32, i32
  }
  func.func @transform_1(%arg0: i32, %arg1: i32, %arg2: i32, %arg3: i32) -> (i32, i32, i32, i32) {
    %c0_i32 = arith.constant 0 : i32
    %c0_i32_0 = arith.constant 0 : i32
    return %arg0, %arg1, %arg3, %c0_i32 : i32, i32, i32, i32
  }
  func.func @transform_2(%arg0: i32, %arg1: i32, %arg2: i32, %arg3: i32) -> (i32, i32, i32, i32) {
    %c0_i32 = arith.constant 0 : i32
    %c0_i32_0 = arith.constant 0 : i32
    return %arg0, %arg1, %arg3, %c0_i32 : i32, i32, i32, i32
  }
  func.func @transform_3(%arg0: i32, %arg1: i32, %arg2: i32, %arg3: i32) -> (i32, i32, i32, i32) {
    %c0_i32 = arith.constant 0 : i32
    %c0_i32_0 = arith.constant 0 : i32
    return %arg0, %arg1, %arg2, %c0_i32 : i32, i32, i32, i32
  }
}

module attributes {stable_mosaic.version = 11 : i64} {
  func.func @_matmul_kernel(%arg0: i32, %arg1: i32, %arg2: i32, %arg3: memref<8x32xbf16, #tpu.memory_space<vmem>>, %arg4: memref<32x32xbf16, #tpu.memory_space<vmem>>, %arg5: memref<1x32xf32, #tpu.memory_space<vmem>>, %arg6: memref<8x32xbf16, #tpu.memory_space<vmem>>, %arg7: memref<8x32xbf16, #tpu.memory_space<vmem>>) attributes {dimension_semantics = [#tpu.dimension_semantics<parallel>, #tpu.dimension_semantics<parallel>, #tpu.dimension_semantics<arbitrary>], iteration_bounds = array<i64: 2, 1, 1>, scalar_prefetch = 0 : i64, scratch_operands = 0 : i64, tpu.core_type = #tpu.core_type<tc>, window_params = [{transform_indices = @transform_0, window_bounds = array<i64: 8, 32>}, {transform_indices = @transform_1, window_bounds = array<i64: 32, 32>}, {transform_indices = @transform_2, window_bounds = array<i64: 1, 32>}, {transform_indices = @transform_3, window_bounds = array<i64: 8, 32>}, {transform_indices = @transform_4, window_bounds = array<i64: 8, 32>}]} {
    %c0 = arith.constant 0 : index
    %c0_0 = arith.constant 0 : index
    %0 = vector.load %arg3[%c0, %c0_0] : memref<8x32xbf16, #tpu.memory_space<vmem>>, vector<8x32xbf16>
    %c0_1 = arith.constant 0 : index
    %c0_2 = arith.constant 0 : index
    %1 = vector.load %arg4[%c0_1, %c0_2] : memref<32x32xbf16, #tpu.memory_space<vmem>>, vector<32x32xbf16>
    %cst = arith.constant dense<0.000000e+00> : vector<8x32xf32>
    %2 = tpu.matmul %0, %1, %cst {dimension_numbers = #tpu.dot_dimension_numbers<[1], [0], [0], [1], [0, 0, 1, 1], [], []>} : vector<8x32xbf16>, vector<32x32xbf16>, vector<8x32xf32> -> vector<8x32xf32>
    %c0_3 = arith.constant 0 : index
    %c0_4 = arith.constant 0 : index
    %3 = vector.load %arg5[%c0_3, %c0_4] : memref<1x32xf32, #tpu.memory_space<vmem>>, vector<1x32xf32>
    %4 = vector.broadcast %3 : vector<1x32xf32> to vector<8x32xf32>
    %5 = arith.addf %2, %4 : vector<8x32xf32>
    %c0_5 = arith.constant 0 : index
    %c0_6 = arith.constant 0 : index
    %6 = vector.load %arg6[%c0_5, %c0_6] : memref<8x32xbf16, #tpu.memory_space<vmem>>, vector<8x32xbf16>
    %7 = arith.extf %6 : vector<8x32xbf16> to vector<8x32xf32>
    %8 = arith.addf %5, %7 : vector<8x32xf32>
    %9 = arith.truncf %8 : vector<8x32xf32> to vector<8x32xbf16>
    %c0_7 = arith.constant 0 : index
    %c0_8 = arith.constant 0 : index
    %10 = vector.load %arg7[%c0_7, %c0_8] : memref<8x32xbf16, #tpu.memory_space<vmem>>, vector<8x32xbf16>
    tpu.vector_store %arg7[%c0_7, %c0_8], %9 {strides = array<i32>} : memref<8x32xbf16, #tpu.memory_space<vmem>>, vector<8x32xbf16>,
    return
  }
  func.func @transform_0(%arg0: i32, %arg1: i32, %arg2: i32) -> (i32, i32) {
    %c0_i32 = arith.constant 0 : i32
    return %arg0, %arg2 : i32, i32
  }
  func.func @transform_1(%arg0: i32, %arg1: i32, %arg2: i32) -> (i32, i32) {
    %c0_i32 = arith.constant 0 : i32
    return %arg2, %arg1 : i32, i32
  }
  func.func @transform_2(%arg0: i32, %arg1: i32, %arg2: i32) -> (i32, i32) {
    %c0_i32 = arith.constant 0 : i32
    %c0_i32_0 = arith.constant 0 : i32
    return %c0_i32, %arg1 : i32, i32
  }
  func.func @transform_3(%arg0: i32, %arg1: i32, %arg2: i32) -> (i32, i32) {
    %c0_i32 = arith.constant 0 : i32
    return %arg0, %arg1 : i32, i32
  }
  func.func @transform_4(%arg0: i32, %arg1: i32, %arg2: i32) -> (i32, i32) {
    %c0_i32 = arith.constant 0 : i32
    return %arg0, %arg1 : i32, i32
  }
}

module attributes {stable_mosaic.version = 11 : i64} {
  func.func @_matmul_kernel(%arg0: i32, %arg1: i32, %arg2: i32, %arg3: memref<8x32xbf16, #tpu.memory_space<vmem>>, %arg4: memref<32x128xbf16, #tpu.memory_space<vmem>>, %arg5: memref<1x32xf32, #tpu.memory_space<vmem>>, %arg6: memref<1x32xf32, #tpu.memory_space<vmem>>, %arg7: memref<1x128xf32, #tpu.memory_space<vmem>>, %arg8: memref<8x128xbf16, #tpu.memory_space<vmem>>) attributes {dimension_semantics = [#tpu.dimension_semantics<parallel>, #tpu.dimension_semantics<parallel>, #tpu.dimension_semantics<arbitrary>], iteration_bounds = array<i64: 2, 1, 1>, scalar_prefetch = 0 : i64, scratch_operands = 0 : i64, tpu.core_type = #tpu.core_type<tc>, window_params = [{transform_indices = @transform_0, window_bounds = array<i64: 8, 32>}, {transform_indices = @transform_1, window_bounds = array<i64: 32, 128>}, {pipeline_mode = #tpu.pipeline_mode<synchronous>, transform_indices = @transform_2, window_bounds = array<i64: 1, 32>}, {pipeline_mode = #tpu.pipeline_mode<synchronous>, transform_indices = @transform_3, window_bounds = array<i64: 1, 32>}, {transform_indices = @transform_4, window_bounds = array<i64: 1, 128>}, {transform_indices = @transform_5, window_bounds = array<i64: 8, 128>}]} {
    %c0 = arith.constant 0 : index
    %c0_0 = arith.constant 0 : index
    %0 = vector.load %arg3[%c0, %c0_0] : memref<8x32xbf16, #tpu.memory_space<vmem>>, vector<8x32xbf16>
    %1 = arith.extf %0 : vector<8x32xbf16> to vector<8x32xf32>
    %cst = arith.constant dense<0.000000e+00> : vector<8xf32>
    %2 = vector.multi_reduction <add>, %1, %cst [1] : vector<8x32xf32> to vector<8xf32>
    %3 = vector.shape_cast %2 : vector<8xf32> to vector<8x1xf32>
    %cst_1 = arith.constant 3.200000e+01 : f32
    %4 = vector.broadcast %cst_1 : f32 to vector<8x1xf32>
    %5 = arith.divf %3, %4 : vector<8x1xf32>
    %6 = vector.broadcast %5 : vector<8x1xf32> to vector<8x32xf32>
    %7 = arith.subf %1, %6 : vector<8x32xf32>
    %8 = arith.mulf %7, %7 : vector<8x32xf32>
    %cst_2 = arith.constant dense<0.000000e+00> : vector<8xf32>
    %9 = vector.multi_reduction <add>, %8, %cst_2 [1] : vector<8x32xf32> to vector<8xf32>
    %10 = vector.shape_cast %9 : vector<8xf32> to vector<8x1xf32>
    %cst_3 = arith.constant 3.200000e+01 : f32
    %11 = vector.broadcast %cst_3 : f32 to vector<8x1xf32>
    %12 = arith.divf %10, %11 : vector<8x1xf32>
    %13 = vector.broadcast %5 : vector<8x1xf32> to vector<8x32xf32>
    %14 = arith.subf %1, %13 : vector<8x32xf32>
    %cst_4 = arith.constant 9.99999974E-6 : f32
    %15 = vector.broadcast %cst_4 : f32 to vector<8x1xf32>
    %16 = arith.addf %12, %15 : vector<8x1xf32>
    %17 = math.rsqrt %16 : vector<8x1xf32>
    %18 = vector.broadcast %17 : vector<8x1xf32> to vector<8x32xf32>
    %19 = arith.mulf %14, %18 : vector<8x32xf32>
    %c0_5 = arith.constant 0 : index
    %c0_6 = arith.constant 0 : index
    %20 = vector.load %arg5[%c0_5, %c0_6] : memref<1x32xf32, #tpu.memory_space<vmem>>, vector<1x32xf32>
    %21 = vector.broadcast %20 : vector<1x32xf32> to vector<8x32xf32>
    %22 = arith.mulf %19, %21 : vector<8x32xf32>
    %c0_7 = arith.constant 0 : index
    %c0_8 = arith.constant 0 : index
    %23 = vector.load %arg6[%c0_7, %c0_8] : memref<1x32xf32, #tpu.memory_space<vmem>>, vector<1x32xf32>
    %24 = vector.broadcast %23 : vector<1x32xf32> to vector<8x32xf32>
    %25 = arith.addf %22, %24 : vector<8x32xf32>
    %26 = arith.truncf %25 : vector<8x32xf32> to vector<8x32xbf16>
    %c0_9 = arith.constant 0 : index
    %c0_10 = arith.constant 0 : index
    %27 = vector.load %arg4[%c0_9, %c0_10] : memref<32x128xbf16, #tpu.memory_space<vmem>>, vector<32x128xbf16>
    %cst_11 = arith.constant dense<0.000000e+00> : vector<8x128xf32>
    %28 = tpu.matmul %26, %27, %cst_11 {dimension_numbers = #tpu.dot_dimension_numbers<[1], [0], [0], [1], [0, 0, 1, 1], [], []>} : vector<8x32xbf16>, vector<32x128xbf16>, vector<8x128xf32> -> vector<8x128xf32>
    %c0_12 = arith.constant 0 : index
    %c0_13 = arith.constant 0 : index
    %29 = vector.load %arg7[%c0_12, %c0_13] : memref<1x128xf32, #tpu.memory_space<vmem>>, vector<1x128xf32>
    %30 = vector.broadcast %29 : vector<1x128xf32> to vector<8x128xf32>
    %31 = arith.addf %28, %30 : vector<8x128xf32>
    %cst_14 = arith.constant 5.000000e-01 : f32
    %32 = vector.broadcast %cst_14 : f32 to vector<8x128xf32>
    %33 = arith.mulf %32, %31 : vector<8x128xf32>
    %cst_15 = arith.constant 4.471500e-02 : f32
    %34 = vector.broadcast %cst_15 : f32 to vector<8x128xf32>
    %35 = arith.mulf %34, %31 : vector<8x128xf32>
    %36 = arith.mulf %35, %31 : vector<8x128xf32>
    %37 = arith.mulf %36, %31 : vector<8x128xf32>
    %38 = arith.addf %31, %37 : vector<8x128xf32>
    %cst_16 = arith.constant 0.797884583 : f32
    %39 = vector.broadcast %cst_16 : f32 to vector<8x128xf32>
    %40 = arith.mulf %39, %38 : vector<8x128xf32>
    %41 = math.tanh %40 : vector<8x128xf32>
    %cst_17 = arith.constant 1.000000e+00 : f32
    %42 = vector.broadcast %cst_17 : f32 to vector<8x128xf32>
    %43 = arith.addf %42, %41 : vector<8x128xf32>
    %44 = arith.mulf %33, %43 : vector<8x128xf32>
    %45 = arith.truncf %44 : vector<8x128xf32> to vector<8x128xbf16>
    %c0_18 = arith.constant 0 : index
    %c0_19 = arith.constant 0 : index
    %46 = vector.load %arg8[%c0_18, %c0_19] : memref<8x128xbf16, #tpu.memory_space<vmem>>, vector<8x128xbf16>
    tpu.vector_store %arg8[%c0_18, %c0_19], %45 {strides = array<i32>} : memref<8x128xbf16, #tpu.memory_space<vmem>>, vector<8x128xbf16>,
    return
  }
  func.func @transform_0(%arg0: i32, %arg1: i32, %arg2: i32) -> (i32, i32) {
    %c0_i32 = arith.constant 0 : i32
    return %arg0, %arg2 : i32, i32
  }
  func.func @transform_1(%arg0: i32, %arg1: i32, %arg2: i32) -> (i32, i32) {
    %c0_i32 = arith.constant 0 : i32
    return %arg2, %arg1 : i32, i32
  }
  func.func @transform_2(%arg0: i32, %arg1: i32, %arg2: i32) -> (i32, i32) {
    %c0_i32 = arith.constant 0 : i32
    %c0_i32_0 = arith.constant 0 : i32
    %c0_i32_1 = arith.constant 0 : i32
    return %c0_i32, %c0_i32_0 : i32, i32
  }
  func.func @transform_3(%arg0: i32, %arg1: i32, %arg2: i32) -> (i32, i32) {
    %c0_i32 = arith.constant 0 : i32
    %c0_i32_0 = arith.constant 0 : i32
    %c0_i32_1 = arith.constant 0 : i32
    return %c0_i32, %c0_i32_0 : i32, i32
  }
  func.func @transform_4(%arg0: i32, %arg1: i32, %arg2: i32) -> (i32, i32) {
    %c0_i32 = arith.constant 0 : i32
    %c0_i32_0 = arith.constant 0 : i32
    return %c0_i32, %arg1 : i32, i32
  }
  func.func @transform_5(%arg0: i32, %arg1: i32, %arg2: i32) -> (i32, i32) {
    %c0_i32 = arith.constant 0 : i32
    return %arg0, %arg1 : i32, i32
  }
}

module attributes {stable_mosaic.version = 11 : i64} {
  func.func @_matmul_kernel(%arg0: i32, %arg1: i32, %arg2: i32, %arg3: memref<8x128xbf16, #tpu.memory_space<vmem>>, %arg4: memref<128x32xbf16, #tpu.memory_space<vmem>>, %arg5: memref<1x32xf32, #tpu.memory_space<vmem>>, %arg6: memref<8x32xbf16, #tpu.memory_space<vmem>>, %arg7: memref<8x32xbf16, #tpu.memory_space<vmem>>) attributes {dimension_semantics = [#tpu.dimension_semantics<parallel>, #tpu.dimension_semantics<parallel>, #tpu.dimension_semantics<arbitrary>], iteration_bounds = array<i64: 2, 1, 1>, scalar_prefetch = 0 : i64, scratch_operands = 0 : i64, tpu.core_type = #tpu.core_type<tc>, window_params = [{transform_indices = @transform_0, window_bounds = array<i64: 8, 128>}, {transform_indices = @transform_1, window_bounds = array<i64: 128, 32>}, {transform_indices = @transform_2, window_bounds = array<i64: 1, 32>}, {transform_indices = @transform_3, window_bounds = array<i64: 8, 32>}, {transform_indices = @transform_4, window_bounds = array<i64: 8, 32>}]} {
    %c0 = arith.constant 0 : index
    %c0_0 = arith.constant 0 : index
    %0 = vector.load %arg3[%c0, %c0_0] : memref<8x128xbf16, #tpu.memory_space<vmem>>, vector<8x128xbf16>
    %c0_1 = arith.constant 0 : index
    %c0_2 = arith.constant 0 : index
    %1 = vector.load %arg4[%c0_1, %c0_2] : memref<128x32xbf16, #tpu.memory_space<vmem>>, vector<128x32xbf16>
    %cst = arith.constant dense<0.000000e+00> : vector<8x32xf32>
    %2 = tpu.matmul %0, %1, %cst {dimension_numbers = #tpu.dot_dimension_numbers<[1], [0], [0], [1], [0, 0, 1, 1], [], []>} : vector<8x128xbf16>, vector<128x32xbf16>, vector<8x32xf32> -> vector<8x32xf32>
    %c0_3 = arith.constant 0 : index
    %c0_4 = arith.constant 0 : index
    %3 = vector.load %arg5[%c0_3, %c0_4] : memref<1x32xf32, #tpu.memory_space<vmem>>, vector<1x32xf32>
    %4 = vector.broadcast %3 : vector<1x32xf32> to vector<8x32xf32>
    %5 = arith.addf %2, %4 : vector<8x32xf32>
    %c0_5 = arith.constant 0 : index
    %c0_6 = arith.constant 0 : index
    %6 = vector.load %arg6[%c0_5, %c0_6] : memref<8x32xbf16, #tpu.memory_space<vmem>>, vector<8x32xbf16>
    %7 = arith.extf %6 : vector<8x32xbf16> to vector<8x32xf32>
    %8 = arith.addf %5, %7 : vector<8x32xf32>
    %9 = arith.truncf %8 : vector<8x32xf32> to vector<8x32xbf16>
    %c0_7 = arith.constant 0 : index
    %c0_8 = arith.constant 0 : index
    %10 = vector.load %arg7[%c0_7, %c0_8] : memref<8x32xbf16, #tpu.memory_space<vmem>>, vector<8x32xbf16>
    tpu.vector_store %arg7[%c0_7, %c0_8], %9 {strides = array<i32>} : memref<8x32xbf16, #tpu.memory_space<vmem>>, vector<8x32xbf16>,
    return
  }
  func.func @transform_0(%arg0: i32, %arg1: i32, %arg2: i32) -> (i32, i32) {
    %c0_i32 = arith.constant 0 : i32
    return %arg0, %arg2 : i32, i32
  }
  func.func @transform_1(%arg0: i32, %arg1: i32, %arg2: i32) -> (i32, i32) {
    %c0_i32 = arith.constant 0 : i32
    return %arg2, %arg1 : i32, i32
  }
  func.func @transform_2(%arg0: i32, %arg1: i32, %arg2: i32) -> (i32, i32) {
    %c0_i32 = arith.constant 0 : i32
    %c0_i32_0 = arith.constant 0 : i32
    return %c0_i32, %arg1 : i32, i32
  }
  func.func @transform_3(%arg0: i32, %arg1: i32, %arg2: i32) -> (i32, i32) {
    %c0_i32 = arith.constant 0 : i32
    return %arg0, %arg1 : i32, i32
  }
  func.func @transform_4(%arg0: i32, %arg1: i32, %arg2: i32) -> (i32, i32) {
    %c0_i32 = arith.constant 0 : i32
    return %arg0, %arg1 : i32, i32
  }
}

module attributes {stable_mosaic.version = 11 : i64} {
  func.func @_layernorm_kernel(%arg0: i32, %arg1: memref<8x32xbf16, #tpu.memory_space<vmem>>, %arg2: memref<1x32xf32, #tpu.memory_space<vmem>>, %arg3: memref<1x32xf32, #tpu.memory_space<vmem>>, %arg4: memref<8x32xbf16, #tpu.memory_space<vmem>>) attributes {dimension_semantics = [#tpu.dimension_semantics<parallel>], iteration_bounds = array<i64: 2>, scalar_prefetch = 0 : i64, scratch_operands = 0 : i64, tpu.core_type = #tpu.core_type<tc>, window_params = [{transform_indices = @transform_0, window_bounds = array<i64: 8, 32>}, {pipeline_mode = #tpu.pipeline_mode<synchronous>, transform_indices = @transform_1, window_bounds = array<i64: 1, 32>}, {pipeline_mode = #tpu.pipeline_mode<synchronous>, transform_indices = @transform_2, window_bounds = array<i64: 1, 32>}, {transform_indices = @transform_3, window_bounds = array<i64: 8, 32>}]} {
    %c0 = arith.constant 0 : index
    %c0_0 = arith.constant 0 : index
    %0 = vector.load %arg1[%c0, %c0_0] : memref<8x32xbf16, #tpu.memory_space<vmem>>, vector<8x32xbf16>
    %1 = arith.extf %0 : vector<8x32xbf16> to vector<8x32xf32>
    %cst = arith.constant dense<0.000000e+00> : vector<8xf32>
    %2 = vector.multi_reduction <add>, %1, %cst [1] : vector<8x32xf32> to vector<8xf32>
    %3 = vector.shape_cast %2 : vector<8xf32> to vector<8x1xf32>
    %cst_1 = arith.constant 3.200000e+01 : f32
    %4 = vector.broadcast %cst_1 : f32 to vector<8x1xf32>
    %5 = arith.divf %3, %4 : vector<8x1xf32>
    %6 = vector.broadcast %5 : vector<8x1xf32> to vector<8x32xf32>
    %7 = arith.subf %1, %6 : vector<8x32xf32>
    %8 = arith.mulf %7, %7 : vector<8x32xf32>
    %cst_2 = arith.constant dense<0.000000e+00> : vector<8xf32>
    %9 = vector.multi_reduction <add>, %8, %cst_2 [1] : vector<8x32xf32> to vector<8xf32>
    %10 = vector.shape_cast %9 : vector<8xf32> to vector<8x1xf32>
    %cst_3 = arith.constant 3.200000e+01 : f32
    %11 = vector.broadcast %cst_3 : f32 to vector<8x1xf32>
    %12 = arith.divf %10, %11 : vector<8x1xf32>
    %13 = vector.broadcast %5 : vector<8x1xf32> to vector<8x32xf32>
    %14 = arith.subf %1, %13 : vector<8x32xf32>
    %cst_4 = arith.constant 9.99999974E-6 : f32
    %15 = vector.broadcast %cst_4 : f32 to vector<8x1xf32>
    %16 = arith.addf %12, %15 : vector<8x1xf32>
    %17 = math.rsqrt %16 : vector<8x1xf32>
    %18 = vector.broadcast %17 : vector<8x1xf32> to vector<8x32xf32>
    %19 = arith.mulf %14, %18 : vector<8x32xf32>
    %c0_5 = arith.constant 0 : index
    %c0_6 = arith.constant 0 : index
    %20 = vector.load %arg2[%c0_5, %c0_6] : memref<1x32xf32, #tpu.memory_space<vmem>>, vector<1x32xf32>
    %21 = vector.broadcast %20 : vector<1x32xf32> to vector<8x32xf32>
    %22 = arith.mulf %19, %21 : vector<8x32xf32>
    %c0_7 = arith.constant 0 : index
    %c0_8 = arith.constant 0 : index
    %23 = vector.load %arg3[%c0_7, %c0_8] : memref<1x32xf32, #tpu.memory_space<vmem>>, vector<1x32xf32>
    %24 = vector.broadcast %23 : vector<1x32xf32> to vector<8x32xf32>
    %25 = arith.addf %22, %24 : vector<8x32xf32>
    %26 = arith.truncf %25 : vector<8x32xf32> to vector<8x32xbf16>
    %c0_9 = arith.constant 0 : index
    %c0_10 = arith.constant 0 : index
    %27 = vector.load %arg4[%c0_9, %c0_10] : memref<8x32xbf16, #tpu.memory_space<vmem>>, vector<8x32xbf16>
    tpu.vector_store %arg4[%c0_9, %c0_10], %26 {strides = array<i32>} : memref<8x32xbf16, #tpu.memory_space<vmem>>, vector<8x32xbf16>,
    return
  }
  func.func @transform_0(%arg0: i32) -> (i32, i32) {
    %c0_i32 = arith.constant 0 : i32
    %c0_i32_0 = arith.constant 0 : i32
    return %arg0, %c0_i32 : i32, i32
  }
  func.func @transform_1(%arg0: i32) -> (i32, i32) {
    %c0_i32 = arith.constant 0 : i32
    %c0_i32_0 = arith.constant 0 : i32
    %c0_i32_1 = arith.constant 0 : i32
    return %c0_i32, %c0_i32_0 : i32, i32
  }
  func.func @transform_2(%arg0: i32) -> (i32, i32) {
    %c0_i32 = arith.constant 0 : i32
    %c0_i32_0 = arith.constant 0 : i32
    %c0_i32_1 = arith.constant 0 : i32
    return %c0_i32, %c0_i32_0 : i32, i32
  }
  func.func @transform_3(%arg0: i32) -> (i32, i32) {
    %c0_i32 = arith.constant 0 : i32
    %c0_i32_0 = arith.constant 0 : i32
    return %arg0, %c0_i32 : i32, i32
  }
}

module attributes {stable_mosaic.version = 11 : i64} {
  func.func @_matmul_kernel(%arg0: i32, %arg1: i32, %arg2: i32, %arg3: memref<8x32xbf16, #tpu.memory_space<vmem>>, %arg4: memref<32x32xbf16, #tpu.memory_space<vmem>>, %arg5: memref<1x32xf32, #tpu.memory_space<vmem>>, %arg6: memref<8x32xbf16, #tpu.memory_space<vmem>>) attributes {dimension_semantics = [#tpu.dimension_semantics<parallel>, #tpu.dimension_semantics<parallel>, #tpu.dimension_semantics<arbitrary>], iteration_bounds = array<i64: 2, 1, 1>, scalar_prefetch = 0 : i64, scratch_operands = 0 : i64, tpu.core_type = #tpu.core_type<tc>, window_params = [{transform_indices = @transform_0, window_bounds = array<i64: 8, 32>}, {transform_indices = @transform_1, window_bounds = array<i64: 32, 32>}, {transform_indices = @transform_2, window_bounds = array<i64: 1, 32>}, {transform_indices = @transform_3, window_bounds = array<i64: 8, 32>}]} {
    %c0 = arith.constant 0 : index
    %c0_0 = arith.constant 0 : index
    %0 = vector.load %arg3[%c0, %c0_0] : memref<8x32xbf16, #tpu.memory_space<vmem>>, vector<8x32xbf16>
    %c0_1 = arith.constant 0 : index
    %c0_2 = arith.constant 0 : index
    %1 = vector.load %arg4[%c0_1, %c0_2] : memref<32x32xbf16, #tpu.memory_space<vmem>>, vector<32x32xbf16>
    %cst = arith.constant dense<0.000000e+00> : vector<8x32xf32>
    %2 = tpu.matmul %0, %1, %cst {dimension_numbers = #tpu.dot_dimension_numbers<[1], [0], [0], [1], [0, 0, 1, 1], [], []>} : vector<8x32xbf16>, vector<32x32xbf16>, vector<8x32xf32> -> vector<8x32xf32>
    %c0_3 = arith.constant 0 : index
    %c0_4 = arith.constant 0 : index
    %3 = vector.load %arg5[%c0_3, %c0_4] : memref<1x32xf32, #tpu.memory_space<vmem>>, vector<1x32xf32>
    %4 = vector.broadcast %3 : vector<1x32xf32> to vector<8x32xf32>
    %5 = arith.addf %2, %4 : vector<8x32xf32>
    %6 = arith.truncf %5 : vector<8x32xf32> to vector<8x32xbf16>
    %c0_5 = arith.constant 0 : index
    %c0_6 = arith.constant 0 : index
    %7 = vector.load %arg6[%c0_5, %c0_6] : memref<8x32xbf16, #tpu.memory_space<vmem>>, vector<8x32xbf16>
    tpu.vector_store %arg6[%c0_5, %c0_6], %6 {strides = array<i32>} : memref<8x32xbf16, #tpu.memory_space<vmem>>, vector<8x32xbf16>,
    return
  }
  func.func @transform_0(%arg0: i32, %arg1: i32, %arg2: i32) -> (i32, i32) {
    %c0_i32 = arith.constant 0 : i32
    return %arg0, %arg2 : i32, i32
  }
  func.func @transform_1(%arg0: i32, %arg1: i32, %arg2: i32) -> (i32, i32) {
    %c0_i32 = arith.constant 0 : i32
    return %arg2, %arg1 : i32, i32
  }
  func.func @transform_2(%arg0: i32, %arg1: i32, %arg2: i32) -> (i32, i32) {
    %c0_i32 = arith.constant 0 : i32
    %c0_i32_0 = arith.constant 0 : i32
    return %c0_i32, %arg1 : i32, i32
  }
  func.func @transform_3(%arg0: i32, %arg1: i32, %arg2: i32) -> (i32, i32) {
    %c0_i32 = arith.constant 0 : i32
    return %arg0, %arg1 : i32, i32
  }
}

module attributes {stable_mosaic.version = 11 : i64} {
  func.func @_matmul_kernel(%arg0: i32, %arg1: i32, %arg2: i32, %arg3: memref<16x32xbf16, #tpu.memory_space<vmem>>, %arg4: memref<32x64xbf16, #tpu.memory_space<vmem>>, %arg5: memref<1x64xf32, #tpu.memory_space<vmem>>, %arg6: memref<16x64xbf16, #tpu.memory_space<vmem>>) attributes {dimension_semantics = [#tpu.dimension_semantics<parallel>, #tpu.dimension_semantics<parallel>, #tpu.dimension_semantics<arbitrary>], iteration_bounds = array<i64: 2, 1, 1>, scalar_prefetch = 0 : i64, scratch_operands = 0 : i64, tpu.core_type = #tpu.core_type<tc>, window_params = [{transform_indices = @transform_0, window_bounds = array<i64: 16, 32>}, {transform_indices = @transform_1, window_bounds = array<i64: 32, 64>}, {transform_indices = @transform_2, window_bounds = array<i64: 1, 64>}, {transform_indices = @transform_3, window_bounds = array<i64: 16, 64>}]} {
    %c0 = arith.constant 0 : index
    %c0_0 = arith.constant 0 : index
    %0 = vector.load %arg3[%c0, %c0_0] : memref<16x32xbf16, #tpu.memory_space<vmem>>, vector<16x32xbf16>
    %c0_1 = arith.constant 0 : index
    %c0_2 = arith.constant 0 : index
    %1 = vector.load %arg4[%c0_1, %c0_2] : memref<32x64xbf16, #tpu.memory_space<vmem>>, vector<32x64xbf16>
    %cst = arith.constant dense<0.000000e+00> : vector<16x64xf32>
    %2 = tpu.matmul %0, %1, %cst {dimension_numbers = #tpu.dot_dimension_numbers<[1], [0], [0], [1], [0, 0, 1, 1], [], []>} : vector<16x32xbf16>, vector<32x64xbf16>, vector<16x64xf32> -> vector<16x64xf32>
    %c0_3 = arith.constant 0 : index
    %c0_4 = arith.constant 0 : index
    %3 = vector.load %arg5[%c0_3, %c0_4] : memref<1x64xf32, #tpu.memory_space<vmem>>, vector<1x64xf32>
    %4 = vector.broadcast %3 : vector<1x64xf32> to vector<16x64xf32>
    %5 = arith.addf %2, %4 : vector<16x64xf32>
    %6 = arith.truncf %5 : vector<16x64xf32> to vector<16x64xbf16>
    %c0_5 = arith.constant 0 : index
    %c0_6 = arith.constant 0 : index
    %7 = vector.load %arg6[%c0_5, %c0_6] : memref<16x64xbf16, #tpu.memory_space<vmem>>, vector<16x64xbf16>
    tpu.vector_store %arg6[%c0_5, %c0_6], %6 {strides = array<i32>} : memref<16x64xbf16, #tpu.memory_space<vmem>>, vector<16x64xbf16>,
    return
  }
  func.func @transform_0(%arg0: i32, %arg1: i32, %arg2: i32) -> (i32, i32) {
    %c0_i32 = arith.constant 0 : i32
    return %arg0, %arg2 : i32, i32
  }
  func.func @transform_1(%arg0: i32, %arg1: i32, %arg2: i32) -> (i32, i32) {
    %c0_i32 = arith.constant 0 : i32
    return %arg2, %arg1 : i32, i32
  }
  func.func @transform_2(%arg0: i32, %arg1: i32, %arg2: i32) -> (i32, i32) {
    %c0_i32 = arith.constant 0 : i32
    %c0_i32_0 = arith.constant 0 : i32
    return %c0_i32, %arg1 : i32, i32
  }
  func.func @transform_3(%arg0: i32, %arg1: i32, %arg2: i32) -> (i32, i32) {
    %c0_i32 = arith.constant 0 : i32
    return %arg0, %arg1 : i32, i32
  }
}

module attributes {stable_mosaic.version = 11 : i64} {
  func.func @_flash_attn_kernel(%arg0: i32, %arg1: i32, %arg2: i32, %arg3: i32, %arg4: memref<1x1x8x8xbf16, #tpu.memory_space<vmem>>, %arg5: memref<1x1x16x8xbf16, #tpu.memory_space<vmem>>, %arg6: memref<1x1x16x8xbf16, #tpu.memory_space<vmem>>, %arg7: memref<1x1x8x8xbf16, #tpu.memory_space<vmem>>, %arg8: memref<8x1xf32, #tpu.memory_space<vmem>>, %arg9: memref<8x1xf32, #tpu.memory_space<vmem>>, %arg10: memref<8x8xf32, #tpu.memory_space<vmem>>) attributes {dimension_semantics = [#tpu.dimension_semantics<parallel>, #tpu.dimension_semantics<parallel>, #tpu.dimension_semantics<parallel>, #tpu.dimension_semantics<arbitrary>], iteration_bounds = array<i64: 2, 4, 1, 1>, scalar_prefetch = 0 : i64, scratch_operands = 3 : i64, tpu.core_type = #tpu.core_type<tc>, window_params = [{transform_indices = @transform_0, window_bounds = array<i64: 1, 1, 8, 8>}, {transform_indices = @transform_1, window_bounds = array<i64: 1, 1, 16, 8>}, {transform_indices = @transform_2, window_bounds = array<i64: 1, 1, 16, 8>}, {transform_indices = @transform_3, window_bounds = array<i64: 1, 1, 8, 8>}]} {
    %c0_i32 = arith.constant 0 : i32
    %0 = arith.cmpi eq, %arg3, %c0_i32 : i32
    %1 = arith.extui %0 : i1 to i32
    %c0_i32_0 = arith.constant 0 : i32
    %2 = arith.cmpi ne, %1, %c0_i32_0 : i32
    scf.if %2 {
      %cst_30 = arith.constant -1.000000e+30 : f32
      %38 = vector.broadcast %cst_30 : f32 to vector<8x1xf32>
      %c0_31 = arith.constant 0 : index
      %c0_32 = arith.constant 0 : index
      %39 = vector.load %arg8[%c0_31, %c0_32] : memref<8x1xf32, #tpu.memory_space<vmem>>, vector<8x1xf32>
      tpu.vector_store %arg8[%c0_31, %c0_32], %38 {strides = array<i32>} : memref<8x1xf32, #tpu.memory_space<vmem>>, vector<8x1xf32>,
      %cst_33 = arith.constant 0.000000e+00 : f32
      %40 = vector.broadcast %cst_33 : f32 to vector<8x1xf32>
      %c0_34 = arith.constant 0 : index
      %c0_35 = arith.constant 0 : index
      %41 = vector.load %arg9[%c0_34, %c0_35] : memref<8x1xf32, #tpu.memory_space<vmem>>, vector<8x1xf32>
      tpu.vector_store %arg9[%c0_34, %c0_35], %40 {strides = array<i32>} : memref<8x1xf32, #tpu.memory_space<vmem>>, vector<8x1xf32>,
      %cst_36 = arith.constant 0.000000e+00 : f32
      %42 = vector.broadcast %cst_36 : f32 to vector<8x8xf32>
      %c0_37 = arith.constant 0 : index
      %c0_38 = arith.constant 0 : index
      %43 = vector.load %arg10[%c0_37, %c0_38] : memref<8x8xf32, #tpu.memory_space<vmem>>, vector<8x8xf32>
      tpu.vector_store %arg10[%c0_37, %c0_38], %42 {strides = array<i32>} : memref<8x8xf32, #tpu.memory_space<vmem>>, vector<8x8xf32>,
    } else {
    }
    %c0 = arith.constant 0 : index
    %c0_1 = arith.constant 0 : index
    %c0_2 = arith.constant 0 : index
    %c0_3 = arith.constant 0 : index
    %3 = vector.load %arg4[%c0, %c0_1, %c0_2, %c0_3] : memref<1x1x8x8xbf16, #tpu.memory_space<vmem>>, vector<1x1x8x8xbf16>
    %4 = vector.shape_cast %3 : vector<1x1x8x8xbf16> to vector<8x8xbf16>
    %c0_4 = arith.constant 0 : index
    %c0_5 = arith.constant 0 : index
    %c0_6 = arith.constant 0 : index
    %c0_7 = arith.constant 0 : index
    %5 = vector.load %arg5[%c0_4, %c0_5, %c0_6, %c0_7] : memref<1x1x16x8xbf16, #tpu.memory_space<vmem>>, vector<1x1x16x8xbf16>
    %6 = vector.shape_cast %5 : vector<1x1x16x8xbf16> to vector<16x8xbf16>
    %cst = arith.constant dense<0.000000e+00> : vector<8x16xf32>
    %7 = tpu.matmul %4, %6, %cst {dimension_numbers = #tpu.dot_dimension_numbers<[1], [1], [0], [0], [0, 0, 1, 0], [], []>} : vector<8x8xbf16>, vector<16x8xbf16>, vector<8x16xf32> -> vector<8x16xf32>
    %cst_8 = arith.constant 0.353553385 : f32
    %8 = vector.broadcast %cst_8 : f32 to vector<8x16xf32>
    %9 = arith.mulf %7, %8 : vector<8x16xf32>
    %c0_9 = arith.constant 0 : index
    %c0_10 = arith.constant 0 : index
    %10 = vector.load %arg8[%c0_9, %c0_10] : memref<8x1xf32, #tpu.memory_space<vmem>>, vector<8x1xf32>
    %cst_11 = arith.constant dense<0xFF800000> : vector<8xf32>
    %11 = vector.multi_reduction <maximumf>, %9, %cst_11 [1] : vector<8x16xf32> to vector<8xf32>
    %12 = vector.shape_cast %11 : vector<8xf32> to vector<8x1xf32>
    %13 = arith.maximumf %10, %12 : vector<8x1xf32>
    %14 = arith.subf %10, %13 : vector<8x1xf32>
    %15 = math.exp %14 : vector<8x1xf32>
    %16 = vector.broadcast %13 : vector<8x1xf32> to vector<8x16xf32>
    %17 = arith.subf %9, %16 : vector<8x16xf32>
    %18 = math.exp %17 : vector<8x16xf32>
    %c0_12 = arith.constant 0 : index
    %c0_13 = arith.constant 0 : index
    %19 = vector.load %arg9[%c0_12, %c0_13] : memref<8x1xf32, #tpu.memory_space<vmem>>, vector<8x1xf32>
    %20 = arith.mulf %15, %19 : vector<8x1xf32>
    %cst_14 = arith.constant dense<0.000000e+00> : vector<8xf32>
    %21 = vector.multi_reduction <add>, %18, %cst_14 [1] : vector<8x16xf32> to vector<8xf32>
    %22 = vector.shape_cast %21 : vector<8xf32> to vector<8x1xf32>
    %23 = arith.addf %20, %22 : vector<8x1xf32>
    %c0_15 = arith.constant 0 : index
    %c0_16 = arith.constant 0 : index
    %24 = vector.load %arg9[%c0_15, %c0_16] : memref<8x1xf32, #tpu.memory_space<vmem>>, vector<8x1xf32>
    tpu.vector_store %arg9[%c0_15, %c0_16], %23 {strides = array<i32>} : memref<8x1xf32, #tpu.memory_space<vmem>>, vector<8x1xf32>,
    %c0_17 = arith.constant 0 : index
    %c0_18 = arith.constant 0 : index
    %25 = vector.load %arg10[%c0_17, %c0_18] : memref<8x8xf32, #tpu.memory_space<vmem>>, vector<8x8xf32>
    %26 = vector.broadcast %15 : vector<8x1xf32> to vector<8x8xf32>
    %27 = arith.mulf %26, %25 : vector<8x8xf32>
    %28 = arith.truncf %18 : vector<8x16xf32> to vector<8x16xbf16>
    %c0_19 = arith.constant 0 : index
    %c0_20 = arith.constant 0 : index
    %c0_21 = arith.constant 0 : index
    %c0_22 = arith.constant 0 : index
    %29 = vector.load %arg6[%c0_19, %c0_20, %c0_21, %c0_22] : memref<1x1x16x8xbf16, #tpu.memory_space<vmem>>, vector<1x1x16x8xbf16>
    %30 = vector.shape_cast %29 : vector<1x1x16x8xbf16> to vector<16x8xbf16>
    %cst_23 = arith.constant dense<0.000000e+00> : vector<8x8xf32>
    %31 = tpu.matmul %28, %30, %cst_23 {dimension_numbers = #tpu.dot_dimension_numbers<[1], [0], [0], [1], [0, 0, 1, 1], [], []>} : vector<8x16xbf16>, vector<16x8xbf16>, vector<8x8xf32> -> vector<8x8xf32>
    %32 = arith.addf %27, %31 : vector<8x8xf32>
    %c0_24 = arith.constant 0 : index
    %c0_25 = arith.constant 0 : index
    %33 = vector.load %arg10[%c0_24, %c0_25] : memref<8x8xf32, #tpu.memory_space<vmem>>, vector<8x8xf32>
    tpu.vector_store %arg10[%c0_24, %c0_25], %32 {strides = array<i32>} : memref<8x8xf32, #tpu.memory_space<vmem>>, vector<8x8xf32>,
    %c0_26 = arith.constant 0 : index
    %c0_27 = arith.constant 0 : index
    %34 = vector.load %arg8[%c0_26, %c0_27] : memref<8x1xf32, #tpu.memory_space<vmem>>, vector<8x1xf32>
    tpu.vector_store %arg8[%c0_26, %c0_27], %13 {strides = array<i32>} : memref<8x1xf32, #tpu.memory_space<vmem>>, vector<8x1xf32>,
    %c0_i32_28 = arith.constant 0 : i32
    %35 = arith.cmpi eq, %arg3, %c0_i32_28 : i32
    %36 = arith.extui %35 : i1 to i32
    %c0_i32_29 = arith.constant 0 : i32
    %37 = arith.cmpi ne, %36, %c0_i32_29 : i32
    scf.if %37 {
      %c0_30 = arith.constant 0 : index
      %c0_31 = arith.constant 0 : index
      %38 = vector.load %arg10[%c0_30, %c0_31] : memref<8x8xf32, #tpu.memory_space<vmem>>, vector<8x8xf32>
      %c0_32 = arith.constant 0 : index
      %c0_33 = arith.constant 0 : index
      %39 = vector.load %arg9[%c0_32, %c0_33] : memref<8x1xf32, #tpu.memory_space<vmem>>, vector<8x1xf32>
      %40 = tpu.reciprocal %39 {approx = true} : vector<8x1xf32> -> vector<8x1xf32>
      %41 = vector.broadcast %40 : vector<8x1xf32> to vector<8x8xf32>
      %42 = arith.mulf %38, %41 : vector<8x8xf32>
      %43 = arith.truncf %42 : vector<8x8xf32> to vector<8x8xbf16>
      %c0_34 = arith.constant 0 : index
      %c0_35 = arith.constant 0 : index
      %c0_36 = arith.constant 0 : index
      %c0_37 = arith.constant 0 : index
      %44 = vector.load %arg7[%c0_34, %c0_35, %c0_36, %c0_37] : memref<1x1x8x8xbf16, #tpu.memory_space<vmem>>, vector<1x1x8x8xbf16>
      %45 = vector.shape_cast %44 : vector<1x1x8x8xbf16> to vector<8x8xbf16>
      %46 = vector.shape_cast %43 : vector<8x8xbf16> to vector<1x1x8x8xbf16>
      tpu.vector_store %arg7[%c0_34, %c0_35, %c0_36, %c0_37], %46 {strides = array<i32>} : memref<1x1x8x8xbf16, #tpu.memory_space<vmem>>, vector<1x1x8x8xbf16>,
    } else {
    }
    return
  }
  func.func @transform_0(%arg0: i32, %arg1: i32, %arg2: i32, %arg3: i32) -> (i32, i32, i32, i32) {
    %c0_i32 = arith.constant 0 : i32
    %c0_i32_0 = arith.constant 0 : i32
    return %arg0, %arg1, %arg2, %c0_i32 : i32, i32, i32, i32
  }
  func.func @transform_1(%arg0: i32, %arg1: i32, %arg2: i32, %arg3: i32) -> (i32, i32, i32, i32) {
    %c0_i32 = arith.constant 0 : i32
    %c0_i32_0 = arith.constant 0 : i32
    return %arg0, %arg1, %arg3, %c0_i32 : i32, i32, i32, i32
  }
  func.func @transform_2(%arg0: i32, %arg1: i32, %arg2: i32, %arg3: i32) -> (i32, i32, i32, i32) {
    %c0_i32 = arith.constant 0 : i32
    %c0_i32_0 = arith.constant 0 : i32
    return %arg0, %arg1, %arg3, %c0_i32 : i32, i32, i32, i32
  }
  func.func @transform_3(%arg0: i32, %arg1: i32, %arg2: i32, %arg3: i32) -> (i32, i32, i32, i32) {
    %c0_i32 = arith.constant 0 : i32
    %c0_i32_0 = arith.constant 0 : i32
    return %arg0, %arg1, %arg2, %c0_i32 : i32, i32, i32, i32
  }
}

module attributes {stable_mosaic.version = 11 : i64} {
  func.func @_matmul_kernel(%arg0: i32, %arg1: i32, %arg2: i32, %arg3: memref<8x32xbf16, #tpu.memory_space<vmem>>, %arg4: memref<32x128xbf16, #tpu.memory_space<vmem>>, %arg5: memref<1x128xf32, #tpu.memory_space<vmem>>, %arg6: memref<8x128xbf16, #tpu.memory_space<vmem>>) attributes {dimension_semantics = [#tpu.dimension_semantics<parallel>, #tpu.dimension_semantics<parallel>, #tpu.dimension_semantics<arbitrary>], iteration_bounds = array<i64: 2, 1, 1>, scalar_prefetch = 0 : i64, scratch_operands = 0 : i64, tpu.core_type = #tpu.core_type<tc>, window_params = [{transform_indices = @transform_0, window_bounds = array<i64: 8, 32>}, {transform_indices = @transform_1, window_bounds = array<i64: 32, 128>}, {transform_indices = @transform_2, window_bounds = array<i64: 1, 128>}, {transform_indices = @transform_3, window_bounds = array<i64: 8, 128>}]} {
    %c0 = arith.constant 0 : index
    %c0_0 = arith.constant 0 : index
    %0 = vector.load %arg3[%c0, %c0_0] : memref<8x32xbf16, #tpu.memory_space<vmem>>, vector<8x32xbf16>
    %c0_1 = arith.constant 0 : index
    %c0_2 = arith.constant 0 : index
    %1 = vector.load %arg4[%c0_1, %c0_2] : memref<32x128xbf16, #tpu.memory_space<vmem>>, vector<32x128xbf16>
    %cst = arith.constant dense<0.000000e+00> : vector<8x128xf32>
    %2 = tpu.matmul %0, %1, %cst {dimension_numbers = #tpu.dot_dimension_numbers<[1], [0], [0], [1], [0, 0, 1, 1], [], []>} : vector<8x32xbf16>, vector<32x128xbf16>, vector<8x128xf32> -> vector<8x128xf32>
    %c0_3 = arith.constant 0 : index
    %c0_4 = arith.constant 0 : index
    %3 = vector.load %arg5[%c0_3, %c0_4] : memref<1x128xf32, #tpu.memory_space<vmem>>, vector<1x128xf32>
    %4 = vector.broadcast %3 : vector<1x128xf32> to vector<8x128xf32>
    %5 = arith.addf %2, %4 : vector<8x128xf32>
    %cst_5 = arith.constant 5.000000e-01 : f32
    %6 = vector.broadcast %cst_5 : f32 to vector<8x128xf32>
    %7 = arith.mulf %6, %5 : vector<8x128xf32>
    %cst_6 = arith.constant 4.471500e-02 : f32
    %8 = vector.broadcast %cst_6 : f32 to vector<8x128xf32>
    %9 = arith.mulf %8, %5 : vector<8x128xf32>
    %10 = arith.mulf %9, %5 : vector<8x128xf32>
    %11 = arith.mulf %10, %5 : vector<8x128xf32>
    %12 = arith.addf %5, %11 : vector<8x128xf32>
    %cst_7 = arith.constant 0.797884583 : f32
    %13 = vector.broadcast %cst_7 : f32 to vector<8x128xf32>
    %14 = arith.mulf %13, %12 : vector<8x128xf32>
    %15 = math.tanh %14 : vector<8x128xf32>
    %cst_8 = arith.constant 1.000000e+00 : f32
    %16 = vector.broadcast %cst_8 : f32 to vector<8x128xf32>
    %17 = arith.addf %16, %15 : vector<8x128xf32>
    %18 = arith.mulf %7, %17 : vector<8x128xf32>
    %19 = arith.truncf %18 : vector<8x128xf32> to vector<8x128xbf16>
    %c0_9 = arith.constant 0 : index
    %c0_10 = arith.constant 0 : index
    %20 = vector.load %arg6[%c0_9, %c0_10] : memref<8x128xbf16, #tpu.memory_space<vmem>>, vector<8x128xbf16>
    tpu.vector_store %arg6[%c0_9, %c0_10], %19 {strides = array<i32>} : memref<8x128xbf16, #tpu.memory_space<vmem>>, vector<8x128xbf16>,
    return
  }
  func.func @transform_0(%arg0: i32, %arg1: i32, %arg2: i32) -> (i32, i32) {
    %c0_i32 = arith.constant 0 : i32
    return %arg0, %arg2 : i32, i32
  }
  func.func @transform_1(%arg0: i32, %arg1: i32, %arg2: i32) -> (i32, i32) {
    %c0_i32 = arith.constant 0 : i32
    return %arg2, %arg1 : i32, i32
  }
  func.func @transform_2(%arg0: i32, %arg1: i32, %arg2: i32) -> (i32, i32) {
    %c0_i32 = arith.constant 0 : i32
    %c0_i32_0 = arith.constant 0 : i32
    return %c0_i32, %arg1 : i32, i32
  }
  func.func @transform_3(%arg0: i32, %arg1: i32, %arg2: i32) -> (i32, i32) {
    %c0_i32 = arith.constant 0 : i32
    return %arg0, %arg1 : i32, i32
  }
}

module attributes {stable_mosaic.version = 11 : i64} {
  func.func @_matmul_kernel(%arg0: i32, %arg1: i32, %arg2: i32, %arg3: memref<8x32xbf16, #tpu.memory_space<vmem>>, %arg4: memref<32x32xbf16, #tpu.memory_space<vmem>>, %arg5: memref<1x32xf32, #tpu.memory_space<vmem>>, %arg6: memref<1x1xf32, #tpu.memory_space<smem>>, %arg7: memref<1x32xf32, #tpu.memory_space<vmem>>, %arg8: memref<1x32xf32, #tpu.memory_space<vmem>>, %arg9: memref<8x32xbf16, #tpu.memory_space<vmem>>, %arg10: memref<8x32xbf16, #tpu.memory_space<vmem>>) attributes {dimension_semantics = [#tpu.dimension_semantics<parallel>, #tpu.dimension_semantics<parallel>, #tpu.dimension_semantics<arbitrary>], iteration_bounds = array<i64: 2, 1, 1>, scalar_prefetch = 0 : i64, scratch_operands = 0 : i64, tpu.core_type = #tpu.core_type<tc>, window_params = [{transform_indices = @transform_0, window_bounds = array<i64: 8, 32>}, {transform_indices = @transform_1, window_bounds = array<i64: 32, 32>}, {transform_indices = @transform_2, window_bounds = array<i64: 1, 32>}, {transform_indices = @transform_3, window_bounds = array<i64: 1, 1>}, {transform_indices = @transform_4, window_bounds = array<i64: 1, 32>}, {transform_indices = @transform_5, window_bounds = array<i64: 1, 32>}, {transform_indices = @transform_6, window_bounds = array<i64: 8, 32>}, {transform_indices = @transform_7, window_bounds = array<i64: 8, 32>}]} {
    %c0 = arith.constant 0 : index
    %c0_0 = arith.constant 0 : index
    %0 = vector.load %arg3[%c0, %c0_0] : memref<8x32xbf16, #tpu.memory_space<vmem>>, vector<8x32xbf16>
    %c0_1 = arith.constant 0 : index
    %c0_2 = arith.constant 0 : index
    %1 = vector.load %arg4[%c0_1, %c0_2] : memref<32x32xbf16, #tpu.memory_space<vmem>>, vector<32x32xbf16>
    %cst = arith.constant dense<0.000000e+00> : vector<8x32xf32>
    %2 = tpu.matmul %0, %1, %cst {dimension_numbers = #tpu.dot_dimension_numbers<[1], [0], [0], [1], [0, 0, 1, 1], [], []>} : vector<8x32xbf16>, vector<32x32xbf16>, vector<8x32xf32> -> vector<8x32xf32>
    %c0_3 = arith.constant 0 : index
    %c0_4 = arith.constant 0 : index
    %3 = vector.load %arg5[%c0_3, %c0_4] : memref<1x32xf32, #tpu.memory_space<vmem>>, vector<1x32xf32>
    %4 = vector.broadcast %3 : vector<1x32xf32> to vector<8x32xf32>
    %5 = arith.addf %2, %4 : vector<8x32xf32>
    %c0_5 = arith.constant 0 : index
    %c0_6 = arith.constant 0 : index
    %6 = vector.load %arg9[%c0_5, %c0_6] : memref<8x32xbf16, #tpu.memory_space<vmem>>, vector<8x32xbf16>
    %7 = arith.extf %6 : vector<8x32xbf16> to vector<8x32xf32>
    %8 = arith.addf %5, %7 : vector<8x32xf32>
    %c0_7 = arith.constant 0 : index
    %c0_8 = arith.constant 0 : index
    %9 = vector.load %arg7[%c0_7, %c0_8] : memref<1x32xf32, #tpu.memory_space<vmem>>, vector<1x32xf32>
    %c0_9 = arith.constant 0 : index
    %c0_10 = arith.constant 0 : index
    %10 = memref.load %arg6[%c0_9, %c0_10] : memref<1x1xf32, #tpu.memory_space<smem>>
    %11 = vector.broadcast %10 : f32 to vector<8x32xf32>
    %12 = arith.mulf %11, %8 : vector<8x32xf32>
    %13 = math.tanh %12 : vector<8x32xf32>
    %14 = vector.broadcast %9 : vector<1x32xf32> to vector<8x32xf32>
    %15 = arith.mulf %14, %13 : vector<8x32xf32>
    %c0_11 = arith.constant 0 : index
    %c0_12 = arith.constant 0 : index
    %16 = vector.load %arg8[%c0_11, %c0_12] : memref<1x32xf32, #tpu.memory_space<vmem>>, vector<1x32xf32>
    %17 = vector.broadcast %16 : vector<1x32xf32> to vector<8x32xf32>
    %18 = arith.addf %15, %17 : vector<8x32xf32>
    %19 = arith.truncf %18 : vector<8x32xf32> to vector<8x32xbf16>
    %c0_13 = arith.constant 0 : index
    %c0_14 = arith.constant 0 : index
    %20 = vector.load %arg10[%c0_13, %c0_14] : memref<8x32xbf16, #tpu.memory_space<vmem>>, vector<8x32xbf16>
    tpu.vector_store %arg10[%c0_13, %c0_14], %19 {strides = array<i32>} : memref<8x32xbf16, #tpu.memory_space<vmem>>, vector<8x32xbf16>,
    return
  }
  func.func @transform_0(%arg0: i32, %arg1: i32, %arg2: i32) -> (i32, i32) {
    %c0_i32 = arith.constant 0 : i32
    return %arg0, %arg2 : i32, i32
  }
  func.func @transform_1(%arg0: i32, %arg1: i32, %arg2: i32) -> (i32, i32) {
    %c0_i32 = arith.constant 0 : i32
    return %arg2, %arg1 : i32, i32
  }
  func.func @transform_2(%arg0: i32, %arg1: i32, %arg2: i32) -> (i32, i32) {
    %c0_i32 = arith.constant 0 : i32
    %c0_i32_0 = arith.constant 0 : i32
    return %c0_i32, %arg1 : i32, i32
  }
  func.func @transform_3(%arg0: i32, %arg1: i32, %arg2: i32) -> (i32, i32) {
    %c0_i32 = arith.constant 0 : i32
    %c0_i32_0 = arith.constant 0 : i32
    %c0_i32_1 = arith.constant 0 : i32
    return %c0_i32, %c0_i32_0 : i32, i32
  }
  func.func @transform_4(%arg0: i32, %arg1: i32, %arg2: i32) -> (i32, i32) {
    %c0_i32 = arith.constant 0 : i32
    %c0_i32_0 = arith.constant 0 : i32
    return %c0_i32, %arg1 : i32, i32
  }
  func.func @transform_5(%arg0: i32, %arg1: i32, %arg2: i32) -> (i32, i32) {
    %c0_i32 = arith.constant 0 : i32
    %c0_i32_0 = arith.constant 0 : i32
    return %c0_i32, %arg1 : i32, i32
  }
  func.func @transform_6(%arg0: i32, %arg1: i32, %arg2: i32) -> (i32, i32) {
    %c0_i32 = arith.constant 0 : i32
    return %arg0, %arg1 : i32, i32
  }
  func.func @transform_7(%arg0: i32, %arg1: i32, %arg2: i32) -> (i32, i32) {
    %c0_i32 = arith.constant 0 : i32
    return %arg0, %arg1 : i32, i32
  }
}

module attributes {stable_mosaic.version = 11 : i64} {
  func.func @_matmul_kernel(%arg0: i32, %arg1: i32, %arg2: i32, %arg3: memref<8x128xbf16, #tpu.memory_space<vmem>>, %arg4: memref<128x32xbf16, #tpu.memory_space<vmem>>, %arg5: memref<1x32xf32, #tpu.memory_space<vmem>>, %arg6: memref<1x1xf32, #tpu.memory_space<smem>>, %arg7: memref<1x32xf32, #tpu.memory_space<vmem>>, %arg8: memref<1x32xf32, #tpu.memory_space<vmem>>, %arg9: memref<8x32xbf16, #tpu.memory_space<vmem>>, %arg10: memref<8x32xbf16, #tpu.memory_space<vmem>>) attributes {dimension_semantics = [#tpu.dimension_semantics<parallel>, #tpu.dimension_semantics<parallel>, #tpu.dimension_semantics<arbitrary>], iteration_bounds = array<i64: 2, 1, 1>, scalar_prefetch = 0 : i64, scratch_operands = 0 : i64, tpu.core_type = #tpu.core_type<tc>, window_params = [{transform_indices = @transform_0, window_bounds = array<i64: 8, 128>}, {transform_indices = @transform_1, window_bounds = array<i64: 128, 32>}, {transform_indices = @transform_2, window_bounds = array<i64: 1, 32>}, {transform_indices = @transform_3, window_bounds = array<i64: 1, 1>}, {transform_indices = @transform_4, window_bounds = array<i64: 1, 32>}, {transform_indices = @transform_5, window_bounds = array<i64: 1, 32>}, {transform_indices = @transform_6, window_bounds = array<i64: 8, 32>}, {transform_indices = @transform_7, window_bounds = array<i64: 8, 32>}]} {
    %c0 = arith.constant 0 : index
    %c0_0 = arith.constant 0 : index
    %0 = vector.load %arg3[%c0, %c0_0] : memref<8x128xbf16, #tpu.memory_space<vmem>>, vector<8x128xbf16>
    %c0_1 = arith.constant 0 : index
    %c0_2 = arith.constant 0 : index
    %1 = vector.load %arg4[%c0_1, %c0_2] : memref<128x32xbf16, #tpu.memory_space<vmem>>, vector<128x32xbf16>
    %cst = arith.constant dense<0.000000e+00> : vector<8x32xf32>
    %2 = tpu.matmul %0, %1, %cst {dimension_numbers = #tpu.dot_dimension_numbers<[1], [0], [0], [1], [0, 0, 1, 1], [], []>} : vector<8x128xbf16>, vector<128x32xbf16>, vector<8x32xf32> -> vector<8x32xf32>
    %c0_3 = arith.constant 0 : index
    %c0_4 = arith.constant 0 : index
    %3 = vector.load %arg5[%c0_3, %c0_4] : memref<1x32xf32, #tpu.memory_space<vmem>>, vector<1x32xf32>
    %4 = vector.broadcast %3 : vector<1x32xf32> to vector<8x32xf32>
    %5 = arith.addf %2, %4 : vector<8x32xf32>
    %c0_5 = arith.constant 0 : index
    %c0_6 = arith.constant 0 : index
    %6 = vector.load %arg7[%c0_5, %c0_6] : memref<1x32xf32, #tpu.memory_space<vmem>>, vector<1x32xf32>
    %c0_7 = arith.constant 0 : index
    %c0_8 = arith.constant 0 : index
    %7 = memref.load %arg6[%c0_7, %c0_8] : memref<1x1xf32, #tpu.memory_space<smem>>
    %8 = vector.broadcast %7 : f32 to vector<8x32xf32>
    %9 = arith.mulf %8, %5 : vector<8x32xf32>
    %10 = math.tanh %9 : vector<8x32xf32>
    %11 = vector.broadcast %6 : vector<1x32xf32> to vector<8x32xf32>
    %12 = arith.mulf %11, %10 : vector<8x32xf32>
    %c0_9 = arith.constant 0 : index
    %c0_10 = arith.constant 0 : index
    %13 = vector.load %arg8[%c0_9, %c0_10] : memref<1x32xf32, #tpu.memory_space<vmem>>, vector<1x32xf32>
    %14 = vector.broadcast %13 : vector<1x32xf32> to vector<8x32xf32>
    %15 = arith.addf %12, %14 : vector<8x32xf32>
    %c0_11 = arith.constant 0 : index
    %c0_12 = arith.constant 0 : index
    %16 = vector.load %arg9[%c0_11, %c0_12] : memref<8x32xbf16, #tpu.memory_space<vmem>>, vector<8x32xbf16>
    %17 = arith.extf %16 : vector<8x32xbf16> to vector<8x32xf32>
    %18 = arith.addf %15, %17 : vector<8x32xf32>
    %19 = arith.truncf %18 : vector<8x32xf32> to vector<8x32xbf16>
    %c0_13 = arith.constant 0 : index
    %c0_14 = arith.constant 0 : index
    %20 = vector.load %arg10[%c0_13, %c0_14] : memref<8x32xbf16, #tpu.memory_space<vmem>>, vector<8x32xbf16>
    tpu.vector_store %arg10[%c0_13, %c0_14], %19 {strides = array<i32>} : memref<8x32xbf16, #tpu.memory_space<vmem>>, vector<8x32xbf16>,
    return
  }
  func.func @transform_0(%arg0: i32, %arg1: i32, %arg2: i32) -> (i32, i32) {
    %c0_i32 = arith.constant 0 : i32
    return %arg0, %arg2 : i32, i32
  }
  func.func @transform_1(%arg0: i32, %arg1: i32, %arg2: i32) -> (i32, i32) {
    %c0_i32 = arith.constant 0 : i32
    return %arg2, %arg1 : i32, i32
  }
  func.func @transform_2(%arg0: i32, %arg1: i32, %arg2: i32) -> (i32, i32) {
    %c0_i32 = arith.constant 0 : i32
    %c0_i32_0 = arith.constant 0 : i32
    return %c0_i32, %arg1 : i32, i32
  }
  func.func @transform_3(%arg0: i32, %arg1: i32, %arg2: i32) -> (i32, i32) {
    %c0_i32 = arith.constant 0 : i32
    %c0_i32_0 = arith.constant 0 : i32
    %c0_i32_1 = arith.constant 0 : i32
    return %c0_i32, %c0_i32_0 : i32, i32
  }
  func.func @transform_4(%arg0: i32, %arg1: i32, %arg2: i32) -> (i32, i32) {
    %c0_i32 = arith.constant 0 : i32
    %c0_i32_0 = arith.constant 0 : i32
    return %c0_i32, %arg1 : i32, i32
  }
  func.func @transform_5(%arg0: i32, %arg1: i32, %arg2: i32) -> (i32, i32) {
    %c0_i32 = arith.constant 0 : i32
    %c0_i32_0 = arith.constant 0 : i32
    return %c0_i32, %arg1 : i32, i32
  }
  func.func @transform_6(%arg0: i32, %arg1: i32, %arg2: i32) -> (i32, i32) {
    %c0_i32 = arith.constant 0 : i32
    return %arg0, %arg1 : i32, i32
  }
  func.func @transform_7(%arg0: i32, %arg1: i32, %arg2: i32) -> (i32, i32) {
    %c0_i32 = arith.constant 0 : i32
    return %arg0, %arg1 : i32, i32
  }
}

module attributes {stable_mosaic.version = 11 : i64} {
  func.func @_matmul_kernel(%arg0: i32, %arg1: i32, %arg2: i32, %arg3: memref<8x32xbf16, #tpu.memory_space<vmem>>, %arg4: memref<32x128xbf16, #tpu.memory_space<vmem>>, %arg5: memref<8x128xf32, #tpu.memory_space<vmem>>) attributes {dimension_semantics = [#tpu.dimension_semantics<parallel>, #tpu.dimension_semantics<parallel>, #tpu.dimension_semantics<arbitrary>], iteration_bounds = array<i64: 2, 1, 1>, scalar_prefetch = 0 : i64, scratch_operands = 0 : i64, tpu.core_type = #tpu.core_type<tc>, window_params = [{transform_indices = @transform_0, window_bounds = array<i64: 8, 32>}, {transform_indices = @transform_1, window_bounds = array<i64: 32, 128>}, {transform_indices = @transform_2, window_bounds = array<i64: 8, 128>}]} {
    %c0 = arith.constant 0 : index
    %c0_0 = arith.constant 0 : index
    %0 = vector.load %arg3[%c0, %c0_0] : memref<8x32xbf16, #tpu.memory_space<vmem>>, vector<8x32xbf16>
    %c0_1 = arith.constant 0 : index
    %c0_2 = arith.constant 0 : index
    %1 = vector.load %arg4[%c0_1, %c0_2] : memref<32x128xbf16, #tpu.memory_space<vmem>>, vector<32x128xbf16>
    %cst = arith.constant dense<0.000000e+00> : vector<8x128xf32>
    %2 = tpu.matmul %0, %1, %cst {dimension_numbers = #tpu.dot_dimension_numbers<[1], [0], [0], [1], [0, 0, 1, 1], [], []>} : vector<8x32xbf16>, vector<32x128xbf16>, vector<8x128xf32> -> vector<8x128xf32>
    %c0_3 = arith.constant 0 : index
    %c0_4 = arith.constant 0 : index
    %3 = vector.load %arg5[%c0_3, %c0_4] : memref<8x128xf32, #tpu.memory_space<vmem>>, vector<8x128xf32>
    tpu.vector_store %arg5[%c0_3, %c0_4], %2 {strides = array<i32>} : memref<8x128xf32, #tpu.memory_space<vmem>>, vector<8x128xf32>,
    return
  }
  func.func @transform_0(%arg0: i32, %arg1: i32, %arg2: i32) -> (i32, i32) {
    %c0_i32 = arith.constant 0 : i32
    return %arg0, %arg2 : i32, i32
  }
  func.func @transform_1(%arg0: i32, %arg1: i32, %arg2: i32) -> (i32, i32) {
    %c0_i32 = arith.constant 0 : i32
    return %arg2, %arg1 : i32, i32
  }
  func.func @transform_2(%arg0: i32, %arg1: i32, %arg2: i32) -> (i32, i32) {
    %c0_i32 = arith.constant 0 : i32
    return %arg0, %arg1 : i32, i32
  }
}

</mosaic_0001>

<bundles_post_ra>
// kernel: _lambda_.18
= control target key start
LH: loop header
LB: loop body
LE: loop exit
PB: predicated region body
PF: predicated region fallthrough
CT: control target
= control target key end

     0   :  { %s631_s18 = smov 0   ;;  %s633_s19 = smov 0   ;;  %s689_s0 = inlined_call_operand.vmem [shape: bf16[16,32], index: 0, kind: input, shape index: {}]   ;;  %s690_s1 = inlined_call_operand.vmem [shape: bf16[32,96], index: 1, kind: input, shape index: {}]   ;;  %s691_s2 = inlined_call_operand.vmem [shape: f32[1,32], index: 2, kind: input, shape index: {}]   ;;  %s692_s3 = inlined_call_operand.vmem [shape: f32[1,32], index: 3, kind: input, shape index: {}]   ;;  %s693_s4 = inlined_call_operand.vmem [shape: f32[1,96], index: 4, kind: input, shape index: {}]   ;;  %s694_s5 = inlined_call_operand.vmem [shape: bf16[16,96], index: 5, kind: output, shape index: {}]  }
   0x1   :  { %s635_s20 = smov 0  }
   0x2 LB: > { %s34_s21 = sadd.s32 1, %s593_s19  ;;  %p523_p0 = scmp.ge.s32.totalorder %s597_s20, 1  ;;  %s597_s20 = sphi %s635_s20, %s15_s20   ;;  %s593_s19 = sphi %s633_s19, %s696_s19   ;;  %s589_s18 = sphi %s631_s18, %s695_s18  }
   0x3   : > { %p36_p1 = scmp.ge.s32.totalorder %s34_s21, 2  ;;  %p236_p2 = scmp.lt.s32.totalorder %s597_s20, 3 }
   0x5   : > { %s698_s21 = smov (%p36_p1, %s34_s21), 0  ;;  %p237_p3 = pnand %p523_p0, %p236_p2 }
   0x6   : > { %p279_p4 = scmp.lt.s32.totalorder (!%p237_p3), %s589_s18, 1  ;;  %vm308_vm0 = vcmask (!%p237_p3), 261120   ;;  %v571_v8 = vld [vmem:[%s690_s1] sm:$0xff] (!%p237_p3)   ;;  %v599_v9 = vmov (!%p237_p3), 0.0   ;;  %v572_v10 = vld [vmem:[%s690_s1 + $0x8] sm:$0xff] (!%p237_p3)   ;;  %vm600_vm1 = vmmov (!%p237_p3), 0  }
   0x7   : > { %240 = sbr.rel (%p237_p3) target bundleno = 552 (0x228), region = 40  ;;  %537 = vmatprep.subr.bf16.mxu0 (!%p237_p3), %v599_v9  ;;  %541 = vmatprep.mubr.msk.bf16.mxu0 (!%p237_p3), %vm600_vm1, %v599_v9  ;;  %v526_v15 = vld [vmem:[%s691_s2] ss:$0 sm:$0xff] (!%p237_p3)  ;;  %vm407_vm2 = vcmask (!%p237_p3), 781312  }
   0x8   : > { %538 = vmatpush3.bf16.msra.mxu0 (!%p237_p3), %v571_v8  ;;  %v527_v17 = vld [vmem:[%s692_s3] ss:$0 sm:$0xff] (!%p237_p3) }
   0x9   : > { %539 = vmatprep.subr.bf16.mxu0 (!%p237_p3), %v599_v9  ;;  %v528_v21 = vld [vmem:[%s693_s4] ss:$0 sm:$0xff] (!%p237_p3) }
   0xc   : > { %540 = vmatpush3.bf16.msra.mxu0 (!%p237_p3), %v572_v10 }
   0xe   : > { %s700_s18 = smov (!%p279_p4, %s589_s18), 1 }
   0xf   : > { %s524_s22 = sshll.u32 %s700_s18, 2 }
  0x10   : > { %s285_s25 = scalar_lea.vmem %s689_s0, %s524_s22  ;;  %s304_s13 = scalar_lea.vmem %s694_s5, %s524_s22 }
  0x11   : > { %v306_v0 = vld [vmem:[%s285_s25] sm:$0xf] }
  0x12   : > { %v307_v1 = vunpack.c.l.bf16 %v306_v0 }
  0x14   : > { %v309_v2 = vsel %vm308_vm0, %v307_v1, 0.0 }
  0x15   : > { %310 = vadd.xlane.f32.xlu0 %v309_v2 }
  0xa2   : > { %v311_v3 = vpop.xlane.xlu0 %310 }
  0xa3   : > { %v313_v4 = vmul.f32 0.03125, %v311_v3 }
  0xa5   : > { %v314_v5 = vsub.f32 %v307_v1, %v313_v4 }
  0xa7   : > { %v315_v6 = vmul.f32 %v314_v5, %v314_v5 }
  0xa9   : > { %v316_v7 = vsel %vm308_vm0, %v315_v6, 0.0 }
  0xaa   : > { %317 = vadd.xlane.f32.xlu0 %v316_v7 }
 0x137   : > { %v318_v11 = vpop.xlane.xlu0 %317 }
 0x138   : > { %v319_v12 = vmul.f32 0.03125, %v318_v11 }
 0x13a   : > { %v320_v13 = vadd.f32 1e-05, %v319_v12 }
 0x13c   : > { %573 = vrsqrt.f32 %v320_v13 }
 0x146   : > { %v574_v14 = vpop.eup %573 }
 0x147   : > { %v322_v16 = vmul.f32 %v574_v14, %v314_v5 }
 0x149   : > { %v330_v18 = vmul.f32 %v526_v15, %v322_v16 }
 0x14b   : > { %v338_v19 = vadd.f32 %v527_v17, %v330_v18 }
 0x14d   : > { %v339_v20 = vpack.c.bf16 %v338_v19, %v338_v19 }
 0x14f   : > { %542 = vmatmul.mubr.msk.bf16.vlgmr.msra.gmra.mrb[0].mxu0 %vm308_vm0, %v339_v20 }
 0x222   : > { %v400_v22 = vpop.f32.mrb[0].mxu0 }
 0x223   : > { %v401_v23 = vadd.f32 %v528_v21, %v400_v22  ;;  %v543_v24 = vpop.f32.mrb[1].mxu0 }
 0x224   : > { %v403_v25 = vpop.f32.mrb[2].mxu0 }
 0x225   : > { %v406_v26 = vpack.c.bf16 %v401_v23, %v401_v23  ;;  %v544_v27 = vpop.f32.mrb[3].mxu0 }
 0x227   : > { %408 = vst.msk [vmem:[%s304_s13] sm:$0xf] %vm407_vm2, %v406_v26 }
 0x228 PF: > { %s15_s20 = sadd.s32 1, %s597_s20   ;;  %s695_s18 = smov %s593_s19 }
 0x229   : > { %p12_p5 = scmp.ge.s32.totalorder %s15_s20, 4   ;;  %s696_s19 = smov %s698_s21 }
 0x22b   :  { %14 = sbr.rel (!%p12_p5) target bundleno = 2 (0x2), region = 76 }

// kernel: _lambda_.20
= control target key start
LH: loop header
LB: loop body
LE: loop exit
PB: predicated region body
PF: predicated region fallthrough
CT: control target
= control target key end

     0   :  { %s610_s15 = smov 0   ;;  %s612_s16 = smov 0   ;;  %s655_s0 = inlined_call_operand.vmem [shape: bf16[16,32], index: 0, kind: input, shape index: {}]   ;;  %s656_s1 = inlined_call_operand.vmem [shape: bf16[32,32], index: 1, kind: input, shape index: {}]   ;;  %s657_s2 = inlined_call_operand.vmem [shape: f32[1,32], index: 2, kind: input, shape index: {}]   ;;  %s658_s3 = inlined_call_operand.vmem [shape: bf16[16,32], index: 3, kind: input, shape index: {}]   ;;  %s659_s4 = inlined_call_operand.vmem [shape: bf16[16,32], index: 4, kind: output, shape index: {}]  }
   0x1   :  { %s614_s17 = smov 0  }
   0x2 LB: > { %s33_s18 = sadd.s32 1, %s577_s16  ;;  %p510_p0 = scmp.ge.s32.totalorder %s581_s17, 1  ;;  %s581_s17 = sphi %s614_s17, %s14_s17   ;;  %s577_s16 = sphi %s612_s16, %s661_s16   ;;  %s573_s15 = sphi %s610_s15, %s660_s15  }
   0x3   : > { %p35_p1 = scmp.ge.s32.totalorder %s33_s18, 2  ;;  %p225_p2 = scmp.lt.s32.totalorder %s581_s17, 3 }
   0x5   : > { %s663_s18 = smov (%p35_p1, %s33_s18), 0  ;;  %p226_p3 = pnand %p510_p0, %p225_p2 }
   0x6   : > { %v557_v0 = vld [vmem:[%s656_s1] sm:$0xff] (!%p226_p3)   ;;  %v583_v1 = vmov (!%p226_p3), 0.0   ;;  %v558_v2 = vld [vmem:[%s656_s1 + $0x8] sm:$0xff] (!%p226_p3)   ;;  %vm584_vm0 = vmmov (!%p226_p3), 0   ;;  %p273_p4 = scmp.lt.s32.totalorder (!%p226_p3), %s573_s15, 1  ;;  %vm331_vm1 = vcmask (!%p226_p3), 261120  }
   0x7   : > { %229 = sbr.rel (%p226_p3) target bundleno = 237 (0xed), region = 36  ;;  %523 = vmatprep.subr.bf16.mxu0 (!%p226_p3), %v583_v1  ;;  %527 = vmatprep.mubr.msk.bf16.mxu0 (!%p226_p3), %vm584_vm0, %v583_v1  ;;  %v514_v5 = vld [vmem:[%s657_s2] ss:$0 sm:$0xff] (!%p226_p3)  ;;  %vm379_vm2 = vcmask (!%p226_p3), 257024  }
   0x8   : > { %524 = vmatpush3.bf16.msra.mxu0 (!%p226_p3), %v557_v0 }
   0x9   : > { %525 = vmatprep.subr.bf16.mxu0 (!%p226_p3), %v583_v1 }
   0xc   : > { %526 = vmatpush3.bf16.msra.mxu0 (!%p226_p3), %v558_v2 }
   0xe   : > { %s665_s15 = smov (!%p273_p4, %s573_s15), 1 }
   0xf   : > { %s511_s23 = sshll.u32 %s665_s15, 2 }
  0x10   : > { %s279_s26 = scalar_lea.vmem %s655_s0, %s511_s23  ;;  %s298_s29 = scalar_lea.vmem %s658_s3, %s511_s23 }
  0x11   : > { %v307_v3 = vld [vmem:[%s279_s26] sm:$0xf]  ;;  %s305_s8 = scalar_lea.vmem %s659_s4, %s511_s23 }
  0x12   : > { %528 = vmatmul.mubr.msk.bf16.vlgmr.msra.gmra.mrb[0].mxu0 %vm331_vm1, %v307_v3  ;;  %v375_v4 = vld [vmem:[%s298_s29] sm:$0xf] }
  0x13   : > { %v376_v6 = vunpack.c.l.bf16 %v375_v4 }
  0xe5   : > { %v369_v7 = vpop.f32.mrb[0].mxu0 }
  0xe6   : > { %v370_v8 = vadd.f32 %v514_v5, %v369_v7  ;;  %v529_v9 = vpop.f32.mrb[1].mxu0 }
  0xe7   : > { %v372_v10 = vpop.f32.mrb[2].mxu0 }
  0xe8   : > { %v377_v11 = vadd.f32 %v376_v6, %v370_v8  ;;  %v530_v12 = vpop.f32.mrb[3].mxu0 }
  0xea   : > { %v378_v13 = vpack.c.bf16 %v377_v11, %v377_v11 }
  0xec   : > { %380 = vst.msk [vmem:[%s305_s8] sm:$0xf] %vm379_vm2, %v378_v13 }
  0xed PF: > { %s14_s17 = sadd.s32 1, %s581_s17   ;;  %s660_s15 = smov %s577_s16 }
  0xee   : > { %p11_p5 = scmp.ge.s32.totalorder %s14_s17, 4   ;;  %s661_s16 = smov %s663_s18 }
  0xf0   :  { %13 = sbr.rel (!%p11_p5) target bundleno = 2 (0x2), region = 75 }

// kernel: _lambda_.21
= control target key start
LH: loop header
LB: loop body
LE: loop exit
PB: predicated region body
PF: predicated region fallthrough
CT: control target
= control target key end

     0   :  { %s641_s18 = smov 0   ;;  %s643_s19 = smov 0   ;;  %s699_s0 = inlined_call_operand.vmem [shape: bf16[16,32], index: 0, kind: input, shape index: {}]   ;;  %s700_s1 = inlined_call_operand.vmem [shape: bf16[32,128], index: 1, kind: input, shape index: {}]   ;;  %s701_s2 = inlined_call_operand.vmem [shape: f32[1,32], index: 2, kind: input, shape index: {}]   ;;  %s702_s3 = inlined_call_operand.vmem [shape: f32[1,32], index: 3, kind: input, shape index: {}]   ;;  %s703_s4 = inlined_call_operand.vmem [shape: f32[1,128], index: 4, kind: input, shape index: {}]   ;;  %s704_s5 = inlined_call_operand.vmem [shape: bf16[16,128], index: 5, kind: output, shape index: {}]  }
   0x1   :  { %s645_s20 = smov 0  }
   0x2 LB: > { %s34_s21 = sadd.s32 1, %s603_s19  ;;  %p531_p0 = scmp.ge.s32.totalorder %s607_s20, 1  ;;  %s607_s20 = sphi %s645_s20, %s15_s20   ;;  %s603_s19 = sphi %s643_s19, %s706_s19   ;;  %s599_s18 = sphi %s641_s18, %s705_s18  }
   0x3   : > { %p36_p1 = scmp.ge.s32.totalorder %s34_s21, 2  ;;  %p236_p2 = scmp.lt.s32.totalorder %s607_s20, 3 }
   0x5   : > { %s708_s21 = smov (%p36_p1, %s34_s21), 0  ;;  %p237_p3 = pnand %p531_p0, %p236_p2 }
   0x6   : > { %p279_p4 = scmp.lt.s32.totalorder (!%p237_p3), %s599_s18, 1  ;;  %vm308_vm0 = vcmask (!%p237_p3), 261120   ;;  %v579_v8 = vld [vmem:[%s700_s1] sm:$0xff] (!%p237_p3)   ;;  %v609_v9 = vmov (!%p237_p3), 0.0   ;;  %v580_v10 = vld [vmem:[%s700_s1 + $0x8] sm:$0xff] (!%p237_p3)   ;;  %vm610_vm1 = vmmov (!%p237_p3), 0  }
   0x7   : > { %240 = sbr.rel (%p237_p3) target bundleno = 577 (0x241), region = 40  ;;  %545 = vmatprep.subr.bf16.mxu0 (!%p237_p3), %v609_v9  ;;  %549 = vmatprep.mubr.msk.bf16.mxu0 (!%p237_p3), %vm610_vm1, %v609_v9  ;;  %v534_v15 = vld [vmem:[%s701_s2] ss:$0 sm:$0xff] (!%p237_p3) }
   0x8   : > { %546 = vmatpush3.bf16.msra.mxu0 (!%p237_p3), %v579_v8  ;;  %v535_v17 = vld [vmem:[%s702_s3] ss:$0 sm:$0xff] (!%p237_p3) }
   0x9   : > { %547 = vmatprep.subr.bf16.mxu0 (!%p237_p3), %v609_v9  ;;  %v536_v21 = vld [vmem:[%s703_s4] ss:$0 sm:$0xff] (!%p237_p3) }
   0xc   : > { %548 = vmatpush3.bf16.msra.mxu0 (!%p237_p3), %v580_v10 }
   0xe   : > { %s710_s18 = smov (!%p279_p4, %s599_s18), 1 }
   0xf   : > { %s532_s22 = sshll.u32 %s710_s18, 2 }
  0x10   : > { %s285_s25 = scalar_lea.vmem %s699_s0, %s532_s22  ;;  %s304_s13 = scalar_lea.vmem %s704_s5, %s532_s22 }
  0x11   : > { %v306_v0 = vld [vmem:[%s285_s25] sm:$0xf] }
  0x12   : > { %v307_v1 = vunpack.c.l.bf16 %v306_v0 }
  0x14   : > { %v309_v2 = vsel %vm308_vm0, %v307_v1, 0.0 }
  0x15   : > { %310 = vadd.xlane.f32.xlu0 %v309_v2 }
  0xa2   : > { %v311_v3 = vpop.xlane.xlu0 %310 }
  0xa3   : > { %v313_v4 = vmul.f32 0.03125, %v311_v3 }
  0xa5   : > { %v314_v5 = vsub.f32 %v307_v1, %v313_v4 }
  0xa7   : > { %v315_v6 = vmul.f32 %v314_v5, %v314_v5 }
  0xa9   : > { %v316_v7 = vsel %vm308_vm0, %v315_v6, 0.0 }
  0xaa   : > { %317 = vadd.xlane.f32.xlu0 %v316_v7 }
 0x137   : > { %v318_v11 = vpop.xlane.xlu0 %317 }
 0x138   : > { %v319_v12 = vmul.f32 0.03125, %v318_v11 }
 0x13a   : > { %v320_v13 = vadd.f32 1e-05, %v319_v12 }
 0x13c   : > { %581 = vrsqrt.f32 %v320_v13 }
 0x146   : > { %v582_v14 = vpop.eup %581 }
 0x147   : > { %v322_v16 = vmul.f32 %v582_v14, %v314_v5 }
 0x149   : > { %v330_v18 = vmul.f32 %v534_v15, %v322_v16 }
 0x14b   : > { %v338_v19 = vadd.f32 %v535_v17, %v330_v18 }
 0x14d   : > { %v339_v20 = vpack.c.bf16 %v338_v19, %v338_v19 }
 0x14f   : > { %550 = vmatmul.mubr.msk.bf16.vlgmr.msra.gmra.mrb[0].mxu0 %vm308_vm0, %v339_v20 }
 0x222   : > { %v400_v22 = vpop.f32.mrb[0].mxu0 }
 0x223   : > { %v401_v23 = vadd.f32 %v536_v21, %v400_v22  ;;  %v551_v24 = vpop.f32.mrb[1].mxu0 }
 0x224   : > { %v403_v25 = vpop.f32.mrb[2].mxu0 }
 0x225   : > { %v407_v26 = vmul.f32 0.044715, %v401_v23  ;;  %v552_v27 = vpop.f32.mrb[3].mxu0  ;;  %v406_v33 = vmul.f32 0.5, %v401_v23 }
 0x227   : > { %v408_v28 = vmul.f32 %v407_v26, %v401_v23 }
 0x229   : > { %v409_v29 = vmul.f32 %v408_v28, %v401_v23 }
 0x22b   : > { %v410_v30 = vadd.f32 %v409_v29, %v401_v23 }
 0x22d   : > { %v411_v31 = vmul.f32 0.7978846, %v410_v30 }
 0x22f   : > { %583 = vtanh.f32 %v411_v31 }
 0x239   : > { %v584_v32 = vpop.eup %583 }
 0x23a   : > { %v413_v34 = vadd.f32 1.0, %v584_v32 }
 0x23c   : > { %v414_v35 = vmul.f32 %v413_v34, %v406_v33 }
 0x23e   : > { %v415_v36 = vpack.c.bf16 %v414_v35, %v414_v35 }
 0x240   : > { %416 = vst [vmem:[%s304_s13] sm:$0xf] %v415_v36 }
 0x241 PF: > { %s15_s20 = sadd.s32 1, %s607_s20   ;;  %s705_s18 = smov %s603_s19 }
 0x242   : > { %p12_p5 = scmp.ge.s32.totalorder %s15_s20, 4   ;;  %s706_s19 = smov %s708_s21 }
 0x244   :  { %14 = sbr.rel (!%p12_p5) target bundleno = 2 (0x2), region = 76 }

// kernel: _lambda_.19
= control target key start
LH: loop header
LB: loop body
LE: loop exit
PB: predicated region body
PF: predicated region fallthrough
CT: control target
= control target key end

     0   :  { %s790_s12 = smov 0   ;;  %s792_s13 = smov 0   ;;  %s864_s0 = inlined_call_operand.vmem [shape: bf16[2,4,8,8], index: 0, kind: input, shape index: {}]   ;;  %s865_s1 = inlined_call_operand.vmem [shape: bf16[2,4,8,8], index: 1, kind: input, shape index: {}]   ;;  %s866_s2 = inlined_call_operand.vmem [shape: bf16[2,4,8,8], index: 2, kind: input, shape index: {}]   ;;  %s867_s3 = inlined_call_operand.vmem [shape: bf16[2,4,8,8], index: 3, kind: output, shape index: {}]  }
   0x1   :  { %s794_s14 = smov 0   ;;  %s796_s15 = smov 0  }
   0x2   :  { %s798_s16 = smov 0  }
   0x3 LB: > { %s35_s17 = sadd.s32 1, %s756_s14  ;;  %s39_s18 = sadd.s32 1, %s760_s15  ;;  %s764_s16 = sphi %s798_s16, %s13_s16   ;;  %s760_s15 = sphi %s796_s15, %s871_s15   ;;  %s756_s14 = sphi %s794_s14, %s870_s14   ;;  %s752_s13 = sphi %s792_s13, %s869_s13   ;;  %s748_s12 = sphi %s790_s12, %s868_s12  }
   0x4   : > { %p37_p0 = scmp.ge.s32.totalorder %s35_s17, 4  ;;  %p645_p1 = scmp.ge.s32.totalorder %s764_s16, 1 }
   0x5   : > { %p217_p2 = scmp.lt.s32.totalorder %s764_s16, 9 }
   0x6   : > { %s873_s17 = smov (%p37_p0, %s35_s17), 0  ;;  %s875_s18 = smov (!%p37_p0, %s39_s18), %s760_s15 }
   0x7   : > { %p218_p3 = pnand %p645_p1, %p217_p2  ;;  %p41_p4 = scmp.ge.s32.totalorder %s875_s18, 2 }
   0x8   : > { %p275_p5 = scmp.lt.s32.totalorder (!%p218_p3), %s752_s13, 1  ;;  %p277_p6 = scmp.lt.s32.totalorder (!%p218_p3), %s748_s12, 3  ;;  %vm327_vm0 = vcmask (!%p218_p3), 64512   ;;  %v766_v0 = vmov (!%p218_p3), 0.0   ;;  %vm767_vm1 = vmmov (!%p218_p3), 0   ;;  %vm324_vm2 = vcmask (!%p218_p3), 7168  }
   0x9   : > { %s877_s18 = smov (%p41_p4, %s875_s18), 0  ;;  %221 = sbr.rel (%p218_p3) target bundleno = 830 (0x33e), region = 32 }
   0xa   : > { %662 = vmatprep.subr.bf16.mxu0 (!%p218_p3), %v766_v0  ;;  %328 = vst.msk [vmem:[#allocation4] sm:$0xff] (!%p218_p3), %vm327_vm0, %v766_v0  ;;  %664 = vmatprep.mubr.msk.bf16.mxu0 (!%p218_p3), %vm767_vm1, %v766_v0  ;;  %v768_v4 = vmov (!%p218_p3), -1e+30   ;;  %v386_v5 = vlaneseq (!%p218_p3)  ;;  %v769_v15 = vmov (!%p218_p3), 0   ;;  %vm432_vm4 = vcmask (!%p218_p3), 1043456  }
   0xb   : > { %668 = vmatprep.subr.bf16.mxu1 (!%p218_p3), %v766_v0  ;;  %670 = vmatprep.mubr.msk.bf16.mxu1 (!%p218_p3), %vm767_vm1, %v766_v0  ;;  %325 = vst.msk [vmem:[#allocation2] sm:$0xff] (!%p218_p3), %vm324_vm2, %v768_v4  ;;  %326 = vst.msk [vmem:[#allocation3] sm:$0xff] (!%p218_p3), %vm324_vm2, %v766_v0  ;;  %vm492_vm5 = vcmask (!%p218_p3), 60416  }
   0xc   : > { %v387_v6 = vshrl.u32 (!%p218_p3), %v386_v5, 7  ;;  %v391_v7 = vand.u32 (!%p218_p3), 127, %v386_v5  ;;  %718 = vset.pattern.permute.xlu0 (!%p218_p3), %v769_v15  ;;  %719 = vset.pattern.permute.xlu1 (!%p218_p3), %v769_v15 }
   0xe   : > { %vm394_vm3 = vcmp.ge.s32.totalorder (!%p218_p3), %v387_v6, %v391_v7 }
  0x10   : > { %s879_s13 = smov (!%p275_p5, %s752_s13), 1  ;;  %s881_s12 = smov (!%p277_p6, %s748_s12), 3 }
  0x11   : > { %s646_s19 = sshll.u32 %s879_s13, 2  ;;  %v420_v36 = vld [vmem:[#allocation4] sm:$0xff] }
  0x12   : > { %s283_s20 = sadd.s32 %s646_s19, %s881_s12  ;;  %v396_v16 = vld [vmem:[#allocation2] sm:$0xff]  ;;  %v412_v30 = vld [vmem:[#allocation3] sm:$0xff] }
  0x13   : > { %s821_s21 = sshll.u32 %s283_s20, 2 }
  0x14   : > { %s296_s24 = scalar_lea.vmem %s865_s1, %s821_s21  ;;  %s285_s27 = scalar_lea.vmem %s864_s0, %s821_s21 }
  0x15   : > { %v337_v1 = vld [vmem:[%s296_s24] sm:$0xf]  ;;  %s307_s30 = scalar_lea.vmem %s866_s2, %s821_s21  ;;  %s318_s6 = scalar_lea.vmem %s867_s3, %s821_s21 }
  0x16   : > { %v343_v2 = vsel %vm327_vm0, %v337_v1, 0  ;;  %v336_v3 = vld [vmem:[%s285_s27] sm:$0xf] }
  0x17   : > { %663 = vmatpush3.bf16.xpose.msra.mxu0 %v343_v2  ;;  %v428_v20 = vld [vmem:[%s307_s30] sm:$0xf] }
  0x18   : > { %v434_v21 = vsel %vm432_vm4, %v428_v20, 0 }
  0x19   : > { %669 = vmatpush3.bf16.msra.mxu1 %v434_v21 }
  0x1e   : > { %665 = vmatmul.mubr.msk.bf16.vlgmr.msra.gmra.mrb[0].mxu0 %vm327_vm0, %v336_v3 }
  0xf1   : > { %v379_v8 = vpop.f32.mrb[0].mxu0 }
  0xf2   : > { %v385_v9 = vmul.f32 0.35355338, %v379_v8  ;;  %v666_v10 = vpop.f32.mrb[1].mxu0 }
  0xf3   : > { %v382_v11 = vpop.f32.mrb[2].mxu0 }
  0xf4   : > { %v667_v12 = vpop.f32.mrb[3].mxu0  ;;  %v395_v13 = vsel %vm394_vm3, %v385_v9, -1e+30 }
  0xf5   : > { %v397_v14 = vsel %vm327_vm0, %v395_v13, -inf }
  0xf6   : > { %398 = vmax.xlane.f32.xlu0 %v397_v14 }
 0x183   : > { %v399_v17 = vpop.xlane.xlu0 %398 }
 0x184   : > { %v400_v18 = vmax.f32 %v396_v16, %v399_v17 }
 0x186   : > { %v401_v19 = vsub.f32 %v396_v16, %v400_v18  ;;  %478 = vst.msk [vmem:[#allocation2] sm:$0xff] %vm324_vm2, %v400_v18  ;;  %406 = vperm.xlu0 %718, %v400_v18  }
 0x188   : > { %v402_v28 = vmul.f32 1.442695, %v401_v19 }
 0x205   : > { %v407_v22 = vpop.permute.xlu0 %406 }
 0x206   : > { %v409_v23 = vsub.f32 %v395_v13, %v407_v22 }
 0x208   : > { %v410_v24 = vmul.f32 1.442695, %v409_v23 }
 0x20a   : > { %720 = vpow2.f32 %v410_v24 }
 0x20b   : > { %722 = vpow2.f32 %v402_v28 }
 0x214   : > { %v721_v25 = vpop.eup %720 }
 0x215   : > { %v414_v26 = vsel %vm327_vm0, %v721_v25, 0.0  ;;  %v427_v27 = vpack.c.bf16 %v721_v25, %v721_v25  ;;  %v723_v29 = vpop.eup %722 }
 0x216   : > { %415 = vadd.xlane.f32.xlu1 %v414_v26  ;;  %v413_v31 = vmul.f32 %v723_v29, %v412_v30 }
 0x217   : > { %671 = vmatmul.mubr.msk.bf16.vlgmr.msra.gmra.mrb[0].mxu1 %vm327_vm0, %v427_v27 }
 0x227   : > { %423 = vperm.xlu1 %719, %v723_v29  }
 0x2a3   : > { %v416_v32 = vpop.xlane.xlu1 %415 }
 0x2a4   : > { %v417_v33 = vadd.f32 %v416_v32, %v413_v31 }
 0x2a6   : > { %419 = vst.msk [vmem:[#allocation3] sm:$0xff] %vm324_vm2, %v417_v33 }
 0x2a7   : > { %v424_v37 = vpop.permute.xlu1 %423 }
 0x2a8   : > { %v426_v38 = vmul.f32 %v424_v37, %v420_v36 }
 0x2ad   : > { %v483_v34 = vld [vmem:[#allocation3] sm:$0xff] }
 0x2ae   : > { %724 = vrcp.f32 %v483_v34 }
 0x2b8   : > { %v725_v35 = vpop.eup %724 }
 0x2b9   : > { %487 = vperm.xlu1 %719, %v725_v35  }
 0x2ea   : > { %v470_v39 = vpop.f32.mrb[0].mxu1 }
 0x2eb   : > { %v476_v40 = vadd.f32 %v470_v39, %v426_v38  ;;  %v672_v41 = vpop.f32.mrb[1].mxu1 }
 0x2ec   : > { %v473_v42 = vpop.f32.mrb[2].mxu1 }
 0x2ed   : > { %477 = vst.msk [vmem:[#allocation4] sm:$0xff] %vm327_vm0, %v476_v40  ;;  %v673_v43 = vpop.f32.mrb[3].mxu1 }
 0x2f4   : > { %v482_v44 = vld [vmem:[#allocation4] sm:$0xff] }
 0x338   : > { %v488_v45 = vpop.permute.xlu1 %487 }
 0x339   : > { %v490_v46 = vmul.f32 %v488_v45, %v482_v44 }
 0x33b   : > { %v491_v47 = vpack.c.bf16 %v490_v46, %v490_v46 }
 0x33d   : > { %493 = vst.msk [vmem:[%s318_s6] sm:$0xf] %vm492_vm5, %v491_v47 }
 0x33e PF: > { %s13_s16 = sadd.s32 1, %s764_s16   ;;  %s868_s12 = smov %s756_s14 }
 0x33f   : > { %p10_p7 = scmp.ge.s32.totalorder %s13_s16, 10   ;;  %s869_s13 = smov %s760_s15 }
 0x340   : > { %s870_s14 = smov %s873_s17  ;;  %s871_s15 = smov %s877_s18 }
 0x341   :  { %12 = sbr.rel (!%p10_p7) target bundleno = 3 (0x3), region = 80 }

// kernel: _lambda_.22
= control target key start
LH: loop header
LB: loop body
LE: loop exit
PB: predicated region body
PF: predicated region fallthrough
CT: control target
= control target key end

     0   :  { %s683_s15 = smov 0   ;;  %s685_s16 = smov 0   ;;  %s750_s0 = inlined_call_operand.vmem [shape: bf16[16,128], index: 0, kind: input, shape index: {}]   ;;  %s751_s1 = inlined_call_operand.vmem [shape: bf16[128,32], index: 1, kind: input, shape index: {}]   ;;  %s752_s2 = inlined_call_operand.vmem [shape: f32[1,32], index: 2, kind: input, shape index: {}]   ;;  %s753_s3 = inlined_call_operand.vmem [shape: bf16[16,32], index: 3, kind: input, shape index: {}]   ;;  %s754_s4 = inlined_call_operand.vmem [shape: bf16[16,32], index: 4, kind: output, shape index: {}]  }
   0x1   :  { %s687_s17 = smov 0  }
   0x2 LB: > { %s33_s18 = sadd.s32 1, %s650_s16  ;;  %p554_p0 = scmp.ge.s32.totalorder %s654_s17, 1  ;;  %s654_s17 = sphi %s687_s17, %s14_s17   ;;  %s650_s16 = sphi %s685_s16, %s756_s16   ;;  %s646_s15 = sphi %s683_s15, %s755_s15  }
   0x3   : > { %p35_p1 = scmp.ge.s32.totalorder %s33_s18, 2  ;;  %p225_p2 = scmp.lt.s32.totalorder %s654_s17, 3 }
   0x5   : > { %s758_s18 = smov (%p35_p1, %s33_s18), 0  ;;  %p226_p3 = pnand %p554_p0, %p225_p2 }
   0x6   : > { %v624_v0 = vld [vmem:[%s751_s1] sm:$0xff] (!%p226_p3)   ;;  %v656_v1 = vmov (!%p226_p3), 0.0   ;;  %v625_v2 = vld [vmem:[%s751_s1 + $0x8] sm:$0xff] (!%p226_p3)   ;;  %vm657_vm0 = vmmov (!%p226_p3), 0   ;;  %v626_v3 = vld [vmem:[%s751_s1 + $0x10] sm:$0xff] (!%p226_p3)   ;;  %p273_p4 = scmp.lt.s32.totalorder (!%p226_p3), %s646_s15, 1 }
   0x7   : > { %229 = sbr.rel (%p226_p3) target bundleno = 258 (0x102), region = 36  ;;  %578 = vmatprep.subr.bf16.mxu0 (!%p226_p3), %v656_v1  ;;  %594 = vmatprep.mubr.msk.bf16.mxu0 (!%p226_p3), %vm657_vm0, %v656_v1  ;;  %v627_v4 = vld [vmem:[%s751_s1 + $0x18] sm:$0xff] (!%p226_p3)   ;;  %v628_v5 = vld [vmem:[%s751_s1 + $0x20] sm:$0xff] (!%p226_p3)   ;;  %v629_v6 = vld [vmem:[%s751_s1 + $0x28] sm:$0xff] (!%p226_p3)   ;;  %vm423_vm1 = vcmask (!%p226_p3), 257024  }
   0x8   : > { %579 = vmatpush3.bf16.msra.mxu0 (!%p226_p3), %v624_v0  ;;  %v630_v7 = vld [vmem:[%s751_s1 + $0x30] sm:$0xff] (!%p226_p3)   ;;  %v631_v8 = vld [vmem:[%s751_s1 + $0x38] sm:$0xff] (!%p226_p3)   ;;  %v558_v11 = vld [vmem:[%s752_s2] ss:$0 sm:$0xff] (!%p226_p3) }
   0x9   : > { %580 = vmatprep.subr.bf16.mxu0 (!%p226_p3), %v656_v1 }
   0xc   : > { %581 = vmatpush3.bf16.msra.mxu0 (!%p226_p3), %v625_v2 }
   0xd   : > { %582 = vmatprep.subr.bf16.mxu0 (!%p226_p3), %v656_v1 }
   0xe   : > { %s760_s15 = smov (!%p273_p4, %s646_s15), 1 }
   0xf   : > { %s555_s7 = sshll.u32 %s760_s15, 2 }
  0x10   : > { %583 = vmatpush3.bf16.msra.mxu0 %v626_v3  ;;  %s279_s12 = scalar_lea.vmem %s750_s0, %s555_s7  ;;  %s298_s19 = scalar_lea.vmem %s753_s3, %s555_s7 }
  0x11   : > { %584 = vmatprep.subr.bf16.mxu0 %v656_v1  ;;  %v307_v9 = vld [vmem:[%s279_s12] sm:$0xf]  ;;  %s305_s23 = scalar_lea.vmem %s754_s4, %s555_s7 }
  0x12   : > { %v419_v10 = vld [vmem:[%s298_s19] sm:$0xf] }
  0x13   : > { %v420_v12 = vunpack.c.l.bf16 %v419_v10 }
  0x14   : > { %585 = vmatpush3.bf16.msra.mxu0 %v627_v4 }
  0x15   : > { %586 = vmatprep.subr.bf16.mxu0 %v656_v1 }
  0x18   : > { %587 = vmatpush3.bf16.msra.mxu0 %v628_v5 }
  0x19   : > { %588 = vmatprep.subr.bf16.mxu0 %v656_v1 }
  0x1c   : > { %589 = vmatpush3.bf16.msra.mxu0 %v629_v6 }
  0x1d   : > { %590 = vmatprep.subr.bf16.mxu0 %v656_v1 }
  0x20   : > { %591 = vmatpush3.bf16.msra.mxu0 %v630_v7 }
  0x21   : > { %592 = vmatprep.subr.bf16.mxu0 %v656_v1 }
  0x24   : > { %593 = vmatpush3.bf16.msra.mxu0 %v631_v8 }
  0x27   : > { %595 = vmatmul.mubr.bf16.vlgmr.msra.gmra.mrb[0].mxu0 %v307_v9 }
  0xfa   : > { %v413_v13 = vpop.f32.mrb[0].mxu0 }
  0xfb   : > { %v414_v14 = vadd.f32 %v558_v11, %v413_v13  ;;  %v596_v15 = vpop.f32.mrb[1].mxu0 }
  0xfc   : > { %v416_v16 = vpop.f32.mrb[2].mxu0 }
  0xfd   : > { %v421_v17 = vadd.f32 %v420_v12, %v414_v14  ;;  %v597_v18 = vpop.f32.mrb[3].mxu0 }
  0xff   : > { %v422_v19 = vpack.c.bf16 %v421_v17, %v421_v17 }
 0x101   : > { %424 = vst.msk [vmem:[%s305_s23] sm:$0xf] %vm423_vm1, %v422_v19 }
 0x102 PF: > { %s14_s17 = sadd.s32 1, %s654_s17   ;;  %s755_s15 = smov %s650_s16 }
 0x103   : > { %p11_p5 = scmp.ge.s32.totalorder %s14_s17, 4   ;;  %s756_s16 = smov %s758_s18 }
 0x105   :  { %13 = sbr.rel (!%p11_p5) target bundleno = 2 (0x2), region = 75 }

// kernel: _lambda_.28
= control target key start
LH: loop header
LB: loop body
LE: loop exit
PB: predicated region body
PF: predicated region fallthrough
CT: control target
= control target key end

     0   :  { %s304_s12 = smov 0   ;;  %s327_s0 = inlined_call_operand.vmem [shape: bf16[16,32], index: 0, kind: input, shape index: {}]   ;;  %s328_s1 = inlined_call_operand.vmem [shape: f32[1,32], index: 1, kind: input, shape index: {}]   ;;  %s329_s2 = inlined_call_operand.vmem [shape: f32[1,32], index: 2, kind: input, shape index: {}]   ;;  %s330_s3 = inlined_call_operand.vmem [shape: bf16[16,32], index: 3, kind: output, shape index: {}]  }
   0x1 LB: > { %s255_s13 = sadd.s32 4294967295, %s282_s12   ;;  %p259_p0 = scmp.ge.s32.totalorder %s282_s12, 1  ;;  %s282_s12 = sphi %s304_s12, %s13_s12  }
   0x2   : > { %p136_p1 = scmp.lt.s32.totalorder %s282_s12, 3 }
   0x4   : > { %p137_p2 = pnand %p259_p0, %p136_p1 }
   0x5   : > { %p158_p3 = scmp.lt.s32.totalorder (!%p137_p2), %s255_s13, 1  ;;  %vm168_vm0 = vcmask (!%p137_p2), 261120   ;;  %v262_v12 = vld [vmem:[%s328_s1] ss:$0 sm:$0xff] (!%p137_p2)  ;;  %vm200_vm1 = vcmask (!%p137_p2), 257024  }
   0x6   : > { %140 = sbr.rel (%p137_p2) target bundleno = 335 (0x14f), region = 32  ;;  %v263_v14 = vld [vmem:[%s329_s2] ss:$0 sm:$0xff] (!%p137_p2) }
   0xd   : > { %s332_s13 = smov (!%p158_p3, %s255_s13), 1 }
   0xe   : > { %s260_s14 = sshll.u32 %s332_s13, 2 }
   0xf   : > { %s161_s17 = scalar_lea.vmem %s327_s0, %s260_s14  ;;  %s165_s24 = scalar_lea.vmem %s330_s3, %s260_s14 }
  0x10   : > { %v166_v0 = vld [vmem:[%s161_s17] sm:$0xf] }
  0x11   : > { %v167_v1 = vunpack.c.l.bf16 %v166_v0 }
  0x13   : > { %v169_v2 = vsel %vm168_vm0, %v167_v1, 0.0 }
  0x14   : > { %170 = vadd.xlane.f32.xlu0 %v169_v2 }
  0xa1   : > { %v171_v3 = vpop.xlane.xlu0 %170 }
  0xa2   : > { %v173_v4 = vmul.f32 0.03125, %v171_v3 }
  0xa4   : > { %v174_v5 = vsub.f32 %v167_v1, %v173_v4 }
  0xa6   : > { %v175_v6 = vmul.f32 %v174_v5, %v174_v5 }
  0xa8   : > { %v176_v7 = vsel %vm168_vm0, %v175_v6, 0.0 }
  0xa9   : > { %177 = vadd.xlane.f32.xlu0 %v176_v7 }
 0x136   : > { %v178_v8 = vpop.xlane.xlu0 %177 }
 0x137   : > { %v179_v9 = vmul.f32 0.03125, %v178_v8 }
 0x139   : > { %v180_v10 = vadd.f32 1e-05, %v179_v9 }
 0x13b   : > { %274 = vrsqrt.f32 %v180_v10 }
 0x145   : > { %v275_v11 = vpop.eup %274 }
 0x146   : > { %v182_v13 = vmul.f32 %v275_v11, %v174_v5 }
 0x148   : > { %v190_v15 = vmul.f32 %v262_v12, %v182_v13 }
 0x14a   : > { %v198_v16 = vadd.f32 %v263_v14, %v190_v15 }
 0x14c   : > { %v199_v17 = vpack.c.bf16 %v198_v16, %v198_v16 }
 0x14e   : > { %201 = vst.msk [vmem:[%s165_s24] sm:$0xf] %vm200_vm1, %v199_v17 }
 0x14f PF: > { %s13_s12 = sadd.s32 1, %s282_s12  }
 0x150   : > { %p10_p4 = scmp.ge.s32.totalorder %s13_s12, 4  }
 0x152   :  { %12 = sbr.rel (!%p10_p4) target bundleno = 1 (0x1), region = 62 }

// kernel: _lambda_.29
= control target key start
LH: loop header
LB: loop body
LE: loop exit
PB: predicated region body
PF: predicated region fallthrough
CT: control target
= control target key end

     0   :  { %s531_s12 = smov 0   ;;  %s533_s13 = smov 0   ;;  %s573_s0 = inlined_call_operand.vmem [shape: bf16[16,32], index: 0, kind: input, shape index: {}]   ;;  %s574_s1 = inlined_call_operand.vmem [shape: bf16[32,32], index: 1, kind: input, shape index: {}]   ;;  %s575_s2 = inlined_call_operand.vmem [shape: f32[1,32], index: 2, kind: input, shape index: {}]   ;;  %s576_s3 = inlined_call_operand.vmem [shape: bf16[16,32], index: 3, kind: output, shape index: {}]  }
   0x1   :  { %s535_s14 = smov 0  }
   0x2 LB: > { %s32_s15 = sadd.s32 1, %s503_s13  ;;  %p437_p0 = scmp.ge.s32.totalorder %s507_s14, 1  ;;  %s507_s14 = sphi %s535_s14, %s13_s14   ;;  %s503_s13 = sphi %s533_s13, %s578_s13   ;;  %s499_s12 = sphi %s531_s12, %s577_s12  }
   0x3   : > { %p34_p1 = scmp.ge.s32.totalorder %s32_s15, 2  ;;  %p186_p2 = scmp.lt.s32.totalorder %s507_s14, 3 }
   0x5   : > { %s580_s15 = smov (%p34_p1, %s32_s15), 0  ;;  %p187_p3 = pnand %p437_p0, %p186_p2 }
   0x6   : > { %v483_v0 = vld [vmem:[%s574_s1] sm:$0xff] (!%p187_p3)   ;;  %v509_v1 = vmov (!%p187_p3), 0.0   ;;  %v484_v2 = vld [vmem:[%s574_s1 + $0x8] sm:$0xff] (!%p187_p3)   ;;  %vm510_vm0 = vmmov (!%p187_p3), 0   ;;  %p225_p4 = scmp.lt.s32.totalorder (!%p187_p3), %s499_s12, 1  ;;  %vm276_vm1 = vcmask (!%p187_p3), 261120  }
   0x7   : > { %190 = sbr.rel (%p187_p3) target bundleno = 235 (0xeb), region = 32  ;;  %449 = vmatprep.subr.bf16.mxu0 (!%p187_p3), %v509_v1  ;;  %453 = vmatprep.mubr.msk.bf16.mxu0 (!%p187_p3), %vm510_vm0, %v509_v1  ;;  %v440_v4 = vld [vmem:[%s575_s2] ss:$0 sm:$0xff] (!%p187_p3)  ;;  %vm321_vm2 = vcmask (!%p187_p3), 257024  }
   0x8   : > { %450 = vmatpush3.bf16.msra.mxu0 (!%p187_p3), %v483_v0 }
   0x9   : > { %451 = vmatprep.subr.bf16.mxu0 (!%p187_p3), %v509_v1 }
   0xc   : > { %452 = vmatpush3.bf16.msra.mxu0 (!%p187_p3), %v484_v2 }
   0xe   : > { %s582_s12 = smov (!%p225_p4, %s499_s12), 1 }
   0xf   : > { %s438_s20 = sshll.u32 %s582_s12, 2 }
  0x10   : > { %s231_s23 = scalar_lea.vmem %s573_s0, %s438_s20  ;;  %s250_s28 = scalar_lea.vmem %s576_s3, %s438_s20 }
  0x11   : > { %v252_v3 = vld [vmem:[%s231_s23] sm:$0xf] }
  0x12   : > { %454 = vmatmul.mubr.msk.bf16.vlgmr.msra.gmra.mrb[0].mxu0 %vm276_vm1, %v252_v3 }
  0xe5   : > { %v314_v5 = vpop.f32.mrb[0].mxu0 }
  0xe6   : > { %v315_v6 = vadd.f32 %v440_v4, %v314_v5  ;;  %v455_v7 = vpop.f32.mrb[1].mxu0 }
  0xe7   : > { %v317_v8 = vpop.f32.mrb[2].mxu0 }
  0xe8   : > { %v320_v9 = vpack.c.bf16 %v315_v6, %v315_v6  ;;  %v456_v10 = vpop.f32.mrb[3].mxu0 }
  0xea   : > { %322 = vst.msk [vmem:[%s250_s28] sm:$0xf] %vm321_vm2, %v320_v9 }
  0xeb PF: > { %s13_s14 = sadd.s32 1, %s507_s14   ;;  %s577_s12 = smov %s503_s13 }
  0xec   : > { %p10_p5 = scmp.ge.s32.totalorder %s13_s14, 4   ;;  %s578_s13 = smov %s580_s15 }
  0xee   :  { %12 = sbr.rel (!%p10_p5) target bundleno = 2 (0x2), region = 68 }

// kernel: _lambda_.30
= control target key start
LH: loop header
LB: loop body
LE: loop exit
PB: predicated region body
PF: predicated region fallthrough
CT: control target
= control target key end

     0   :  { %s565_s12 = smov 0   ;;  %s567_s13 = smov 0   ;;  %s607_s0 = inlined_call_operand.vmem [shape: bf16[32,32], index: 0, kind: input, shape index: {}]   ;;  %s608_s1 = inlined_call_operand.vmem [shape: bf16[32,64], index: 1, kind: input, shape index: {}]   ;;  %s609_s2 = inlined_call_operand.vmem [shape: f32[1,64], index: 2, kind: input, shape index: {}]   ;;  %s610_s3 = inlined_call_operand.vmem [shape: bf16[32,64], index: 3, kind: output, shape index: {}]  }
   0x1   :  { %s569_s14 = smov 0  }
   0x2 LB: > { %s32_s15 = sadd.s32 1, %s537_s13  ;;  %p463_p0 = scmp.ge.s32.totalorder %s541_s14, 1  ;;  %s541_s14 = sphi %s569_s14, %s13_s14   ;;  %s537_s13 = sphi %s567_s13, %s612_s13   ;;  %s533_s12 = sphi %s565_s12, %s611_s12  }
   0x3   : > { %p34_p1 = scmp.ge.s32.totalorder %s32_s15, 2  ;;  %p188_p2 = scmp.lt.s32.totalorder %s541_s14, 3 }
   0x5   : > { %s614_s15 = smov (%p34_p1, %s32_s15), 0  ;;  %p189_p3 = pnand %p463_p0, %p188_p2 }
   0x6   : > { %v516_v0 = vld [vmem:[%s608_s1] sm:$0xff] (!%p189_p3)   ;;  %v543_v1 = vmov (!%p189_p3), 0.0   ;;  %v517_v2 = vld [vmem:[%s608_s1 + $0x8] sm:$0xff] (!%p189_p3)   ;;  %vm544_vm0 = vmmov (!%p189_p3), 0   ;;  %s464_s20 = sshll.u32 (!%p189_p3), %s533_s12, 1  ;;  %vm290_vm1 = vcmask (!%p189_p3), 261120  }
   0x7   : > { %192 = sbr.rel (%p189_p3) target bundleno = 237 (0xed), region = 32  ;;  %482 = vmatprep.subr.bf16.mxu0 (!%p189_p3), %v543_v1  ;;  %486 = vmatprep.mubr.msk.bf16.mxu0 (!%p189_p3), %vm544_vm0, %v543_v1  ;;  %p230_p4 = scmp.lt.s32.totalorder (!%p189_p3), %s464_s20, 3  ;;  %v468_v4 = vld [vmem:[%s609_s2] ss:$0 sm:$0xff] (!%p189_p3)  ;;  %vm343_vm2 = vcmask (!%p189_p3), 519168  }
   0x8   : > { %483 = vmatpush3.bf16.msra.mxu0 (!%p189_p3), %v516_v0 }
   0x9   : > { %484 = vmatprep.subr.bf16.mxu0 (!%p189_p3), %v543_v1 }
   0xc   : > { %485 = vmatpush3.bf16.msra.mxu0 (!%p189_p3), %v517_v2 }
   0xe   : > { %s616_s20 = smov (!%p230_p4, %s464_s20), 3 }
   0xf   : > { %s465_s21 = sshll.u32 %s616_s20, 2 }
  0x10   : > { %s236_s24 = scalar_lea.vmem %s607_s0, %s465_s21  ;;  %s257_s29 = scalar_lea.vmem %s610_s3, %s465_s21 }
  0x11   : > { %v518_v3 = vld [vmem:[%s236_s24] sm:$0xff]  }
  0x12   : > { %487 = vmatmul.mubr.msk.bf16.vlgmr.msra.gmra.mrb[0].mxu0 %vm290_vm1, %v518_v3 }
  0xe5   : > { %v328_v5 = vpop.f32.mrb[0].mxu0 }
  0xe6   : > { %v329_v6 = vadd.f32 %v468_v4, %v328_v5  ;;  %v488_v7 = vpop.f32.mrb[1].mxu0 }
  0xe7   : > { %v331_v8 = vpop.f32.mrb[2].mxu0 }
  0xe8   : > { %v477_v9 = vpack.c.bf16 %v329_v6, %v329_v6  ;;  %v332_v10 = vadd.f32 %v468_v4, %v331_v8  ;;  %v489_v11 = vpop.f32.mrb[3].mxu0 }
  0xea   : > { %344 = vst.msk [vmem:[%s257_s29] sm:$0xf] %vm343_vm2, %v477_v9  ;;  %v478_v12 = vpack.c.bf16 %v332_v10, %v332_v10 }
  0xec   : > { %345 = vst.msk [vmem:[%s257_s29 + $0x4] sm:$0xf] %vm343_vm2, %v478_v12 }
  0xed PF: > { %s13_s14 = sadd.s32 1, %s541_s14   ;;  %s611_s12 = smov %s537_s13 }
  0xee   : > { %p10_p5 = scmp.ge.s32.totalorder %s13_s14, 4   ;;  %s612_s13 = smov %s614_s15 }
  0xf0   :  { %12 = sbr.rel (!%p10_p5) target bundleno = 2 (0x2), region = 68 }

// kernel: _lambda_.33
= control target key start
LH: loop header
LB: loop body
LE: loop exit
PB: predicated region body
PF: predicated region fallthrough
CT: control target
= control target key end

     0   :  { %s541_s12 = smov 0   ;;  %s543_s13 = smov 0   ;;  %s583_s0 = inlined_call_operand.vmem [shape: bf16[16,32], index: 0, kind: input, shape index: {}]   ;;  %s584_s1 = inlined_call_operand.vmem [shape: bf16[32,128], index: 1, kind: input, shape index: {}]   ;;  %s585_s2 = inlined_call_operand.vmem [shape: f32[1,128], index: 2, kind: input, shape index: {}]   ;;  %s586_s3 = inlined_call_operand.vmem [shape: bf16[16,128], index: 3, kind: output, shape index: {}]  }
   0x1   :  { %s545_s14 = smov 0  }
   0x2 LB: > { %s32_s15 = sadd.s32 1, %s513_s13  ;;  %p445_p0 = scmp.ge.s32.totalorder %s517_s14, 1  ;;  %s517_s14 = sphi %s545_s14, %s13_s14   ;;  %s513_s13 = sphi %s543_s13, %s588_s13   ;;  %s509_s12 = sphi %s541_s12, %s587_s12  }
   0x3   : > { %p34_p1 = scmp.ge.s32.totalorder %s32_s15, 2  ;;  %p186_p2 = scmp.lt.s32.totalorder %s517_s14, 3 }
   0x5   : > { %s590_s15 = smov (%p34_p1, %s32_s15), 0  ;;  %p187_p3 = pnand %p445_p0, %p186_p2 }
   0x6   : > { %v491_v0 = vld [vmem:[%s584_s1] sm:$0xff] (!%p187_p3)   ;;  %v519_v1 = vmov (!%p187_p3), 0.0   ;;  %v492_v2 = vld [vmem:[%s584_s1 + $0x8] sm:$0xff] (!%p187_p3)   ;;  %vm520_vm0 = vmmov (!%p187_p3), 0   ;;  %p225_p4 = scmp.lt.s32.totalorder (!%p187_p3), %s509_s12, 1  ;;  %vm276_vm1 = vcmask (!%p187_p3), 261120  }
   0x7   : > { %190 = sbr.rel (%p187_p3) target bundleno = 260 (0x104), region = 32  ;;  %457 = vmatprep.subr.bf16.mxu0 (!%p187_p3), %v519_v1  ;;  %461 = vmatprep.mubr.msk.bf16.mxu0 (!%p187_p3), %vm520_vm0, %v519_v1  ;;  %v448_v4 = vld [vmem:[%s585_s2] ss:$0 sm:$0xff] (!%p187_p3) }
   0x8   : > { %458 = vmatpush3.bf16.msra.mxu0 (!%p187_p3), %v491_v0 }
   0x9   : > { %459 = vmatprep.subr.bf16.mxu0 (!%p187_p3), %v519_v1 }
   0xc   : > { %460 = vmatpush3.bf16.msra.mxu0 (!%p187_p3), %v492_v2 }
   0xe   : > { %s592_s12 = smov (!%p225_p4, %s509_s12), 1 }
   0xf   : > { %s446_s20 = sshll.u32 %s592_s12, 2 }
  0x10   : > { %s231_s23 = scalar_lea.vmem %s583_s0, %s446_s20  ;;  %s250_s28 = scalar_lea.vmem %s586_s3, %s446_s20 }
  0x11   : > { %v252_v3 = vld [vmem:[%s231_s23] sm:$0xf] }
  0x12   : > { %462 = vmatmul.mubr.msk.bf16.vlgmr.msra.gmra.mrb[0].mxu0 %vm276_vm1, %v252_v3 }
  0xe5   : > { %v314_v5 = vpop.f32.mrb[0].mxu0 }
  0xe6   : > { %v315_v6 = vadd.f32 %v448_v4, %v314_v5  ;;  %v463_v7 = vpop.f32.mrb[1].mxu0 }
  0xe7   : > { %v317_v8 = vpop.f32.mrb[2].mxu0 }
  0xe8   : > { %v321_v9 = vmul.f32 0.044715, %v315_v6  ;;  %v464_v10 = vpop.f32.mrb[3].mxu0  ;;  %v320_v16 = vmul.f32 0.5, %v315_v6 }
  0xea   : > { %v322_v11 = vmul.f32 %v321_v9, %v315_v6 }
  0xec   : > { %v323_v12 = vmul.f32 %v322_v11, %v315_v6 }
  0xee   : > { %v324_v13 = vadd.f32 %v323_v12, %v315_v6 }
  0xf0   : > { %v325_v14 = vmul.f32 0.7978846, %v324_v13 }
  0xf2   : > { %493 = vtanh.f32 %v325_v14 }
  0xfc   : > { %v494_v15 = vpop.eup %493 }
  0xfd   : > { %v327_v17 = vadd.f32 1.0, %v494_v15 }
  0xff   : > { %v328_v18 = vmul.f32 %v327_v17, %v320_v16 }
 0x101   : > { %v329_v19 = vpack.c.bf16 %v328_v18, %v328_v18 }
 0x103   : > { %330 = vst [vmem:[%s250_s28] sm:$0xf] %v329_v19 }
 0x104 PF: > { %s13_s14 = sadd.s32 1, %s517_s14   ;;  %s587_s12 = smov %s513_s13 }
 0x105   : > { %p10_p5 = scmp.ge.s32.totalorder %s13_s14, 4   ;;  %s588_s13 = smov %s590_s15 }
 0x107   :  { %12 = sbr.rel (!%p10_p5) target bundleno = 2 (0x2), region = 68 }

// kernel: _lambda_.32
= control target key start
LH: loop header
LB: loop body
LE: loop exit
PB: predicated region body
PF: predicated region fallthrough
CT: control target
= control target key end

     0   :  { %s788_s26 = smov 0   ;;  %s790_s27 = smov 0   ;;  %s839_s0 = inlined_call_operand.vmem [shape: bf16[16,32], index: 0, kind: input, shape index: {}]   ;;  %s840_s1 = inlined_call_operand.vmem [shape: bf16[32,32], index: 1, kind: input, shape index: {}]   ;;  %s841_s2 = inlined_call_operand.vmem [shape: f32[1,32], index: 2, kind: input, shape index: {}, may-alias: {2,5}]   ;;  %s842_s3 = inlined_call_operand.<no memory space> [shape: f32[1,1], index: 3, kind: input, shape index: {}]   ;;  %s843_s4 = inlined_call_operand.vmem [shape: f32[1,32], index: 4, kind: input, shape index: {}]   ;;  %s844_s5 = inlined_call_operand.vmem [shape: f32[1,32], index: 5, kind: input, shape index: {}, may-alias: {2,5}]   ;;  %s845_s6 = inlined_call_operand.vmem [shape: bf16[16,32], index: 6, kind: input, shape index: {}]   ;;  %s846_s7 = inlined_call_operand.vmem [shape: bf16[16,32], index: 7, kind: output, shape index: {}]  }
   0x1   :  { %12 = sst [smem:[#allocation2]] %s842_s3  ;;  %s792_s28 = smov 0  }
   0x2 LB: > { %s37_s3 = sadd.s32 1, %s737_s27  ;;  %p666_p0 = scmp.ge.s32.totalorder %s741_s28, 1  ;;  %s741_s28 = sphi %s792_s28, %s18_s28   ;;  %s737_s27 = sphi %s790_s27, %s848_s27   ;;  %s733_s26 = sphi %s788_s26, %s847_s26  }
   0x3   : > { %p39_p1 = scmp.ge.s32.totalorder %s37_s3, 2  ;;  %p317_p2 = scmp.lt.s32.totalorder %s741_s28, 3 }
   0x5   : > { %s850_s3 = smov (%p39_p1, %s37_s3), 0  ;;  %p318_p3 = pnand %p666_p0, %p317_p2 }
   0x6   : > { %v715_v0 = vld [vmem:[%s840_s1] sm:$0xff] (!%p318_p3)   ;;  %v743_v1 = vmov (!%p318_p3), 0.0   ;;  %v716_v2 = vld [vmem:[%s840_s1 + $0x8] sm:$0xff] (!%p318_p3)   ;;  %vm744_vm0 = vmmov (!%p318_p3), 0   ;;  %p377_p4 = scmp.lt.s32.totalorder (!%p318_p3), %s733_s26, 1  ;;  %vm441_vm1 = vcmask (!%p318_p3), 261120  }
   0x7   : > { %321 = sbr.rel (%p318_p3) target bundleno = 254 (0xfe), region = 48  ;;  %681 = vmatprep.subr.bf16.mxu0 (!%p318_p3), %v743_v1  ;;  %685 = vmatprep.mubr.msk.bf16.mxu0 (!%p318_p3), %vm744_vm0, %v743_v1  ;;  %s489_s17 = sld [smem:[#allocation2]] (!%p318_p3)  ;;  %v670_v5 = vld [vmem:[%s841_s2] ss:$0 sm:$0xff] (!%p318_p3)  ;;  %vm509_vm2 = vcmask (!%p318_p3), 257024  }
   0x8   : > { %682 = vmatpush3.bf16.msra.mxu0 (!%p318_p3), %v715_v0  ;;  %v674_v15 = vld [vmem:[%s843_s4] ss:$0 sm:$0xff] (!%p318_p3) }
   0x9   : > { %683 = vmatprep.subr.bf16.mxu0 (!%p318_p3), %v743_v1  ;;  %v675_v17 = vld [vmem:[%s844_s5] ss:$0 sm:$0xff] (!%p318_p3) }
   0xc   : > { %684 = vmatpush3.bf16.msra.mxu0 (!%p318_p3), %v716_v2 }
   0xd   : > { %v490_v10 = vstv (!%p318_p3), %s489_s17 }
   0xe   : > { %s852_s26 = smov (!%p377_p4, %s733_s26), 1 }
   0xf   : > { %s667_s10 = sshll.u32 %s852_s26, 2 }
  0x10   : > { %s383_s13 = scalar_lea.vmem %s839_s0, %s667_s10  ;;  %s408_s16 = scalar_lea.vmem %s845_s6, %s667_s10 }
  0x11   : > { %v417_v3 = vld [vmem:[%s383_s13] sm:$0xf]  ;;  %s415_s26 = scalar_lea.vmem %s846_s7, %s667_s10 }
  0x12   : > { %686 = vmatmul.mubr.msk.bf16.vlgmr.msra.gmra.mrb[0].mxu0 %vm441_vm1, %v417_v3  ;;  %v485_v4 = vld [vmem:[%s408_s16] sm:$0xf] }
  0x13   : > { %v486_v6 = vunpack.c.l.bf16 %v485_v4 }
  0xe5   : > { %v479_v7 = vpop.f32.mrb[0].mxu0 }
  0xe6   : > { %v480_v8 = vadd.f32 %v670_v5, %v479_v7  ;;  %v687_v9 = vpop.f32.mrb[1].mxu0 }
  0xe7   : > { %v482_v11 = vpop.f32.mrb[2].mxu0 }
  0xe8   : > { %v487_v12 = vadd.f32 %v486_v6, %v480_v8  ;;  %v688_v13 = vpop.f32.mrb[3].mxu0 }
  0xea   : > { %v491_v14 = vmul.f32 %v490_v10, %v487_v12 }
  0xec   : > { %717 = vtanh.f32 %v491_v14 }
  0xf6   : > { %v718_v16 = vpop.eup %717 }
  0xf7   : > { %v499_v18 = vmul.f32 %v718_v16, %v674_v15 }
  0xf9   : > { %v507_v19 = vadd.f32 %v675_v17, %v499_v18 }
  0xfb   : > { %v508_v20 = vpack.c.bf16 %v507_v19, %v507_v19 }
  0xfd   : > { %510 = vst.msk [vmem:[%s415_s26] sm:$0xf] %vm509_vm2, %v508_v20 }
  0xfe PF: > { %s18_s28 = sadd.s32 1, %s741_s28   ;;  %s847_s26 = smov %s737_s27 }
  0xff   : > { %p15_p5 = scmp.ge.s32.totalorder %s18_s28, 4   ;;  %s848_s27 = smov %s850_s3 }
 0x101   :  { %17 = sbr.rel (!%p15_p5) target bundleno = 2 (0x2), region = 93 }

// kernel: _lambda_.31
= control target key start
LH: loop header
LB: loop body
LE: loop exit
PB: predicated region body
PF: predicated region fallthrough
CT: control target
= control target key end

     0   :  { %s811_s12 = smov 0   ;;  %s813_s13 = smov 0   ;;  %s893_s0 = inlined_call_operand.vmem [shape: bf16[2,4,8,8], index: 0, kind: input, shape index: {}]   ;;  %s894_s1 = inlined_call_operand.vmem [shape: bf16[2,4,16,8], index: 1, kind: input, shape index: {}]   ;;  %s895_s2 = inlined_call_operand.vmem [shape: bf16[2,4,16,8], index: 2, kind: input, shape index: {}]   ;;  %s896_s3 = inlined_call_operand.vmem [shape: bf16[2,4,8,8], index: 3, kind: output, shape index: {}]  }
   0x1   :  { %s815_s14 = smov 0   ;;  %s817_s15 = smov 0  }
   0x2   :  { %s819_s16 = smov 0  }
   0x3 LB: > { %s35_s17 = sadd.s32 1, %s777_s14  ;;  %s39_s18 = sadd.s32 1, %s781_s15  ;;  %s785_s16 = sphi %s819_s16, %s13_s16   ;;  %s781_s15 = sphi %s817_s15, %s900_s15   ;;  %s777_s14 = sphi %s815_s14, %s899_s14   ;;  %s773_s13 = sphi %s813_s13, %s898_s13   ;;  %s769_s12 = sphi %s811_s12, %s897_s12  }
   0x4   : > { %p37_p0 = scmp.ge.s32.totalorder %s35_s17, 4  ;;  %p660_p1 = scmp.ge.s32.totalorder %s785_s16, 1 }
   0x5   : > { %p223_p2 = scmp.lt.s32.totalorder %s785_s16, 9 }
   0x6   : > { %s902_s17 = smov (%p37_p0, %s35_s17), 0  ;;  %s904_s18 = smov (!%p37_p0, %s39_s18), %s781_s15 }
   0x7   : > { %p224_p3 = pnand %p660_p1, %p223_p2  ;;  %p41_p4 = scmp.ge.s32.totalorder %s904_s18, 2 }
   0x8   : > { %p285_p5 = scmp.lt.s32.totalorder (!%p224_p3), %s773_s13, 1  ;;  %p287_p6 = scmp.lt.s32.totalorder (!%p224_p3), %s769_s12, 3  ;;  %vm343_vm0 = vcmask (!%p224_p3), 64512   ;;  %v787_v0 = vmov (!%p224_p3), 0.0   ;;  %vm788_vm1 = vmmov (!%p224_p3), 0   ;;  %vm340_vm2 = vcmask (!%p224_p3), 7168  }
   0x9   : > { %s906_s18 = smov (%p41_p4, %s904_s18), 0  ;;  %227 = sbr.rel (%p224_p3) target bundleno = 830 (0x33e), region = 32 }
   0xa   : > { %681 = vmatprep.subr.bf16.mxu0 (!%p224_p3), %v787_v0  ;;  %344 = vst.msk [vmem:[#allocation4] sm:$0xff] (!%p224_p3), %vm343_vm0, %v787_v0  ;;  %683 = vmatprep.mubr.msk.bf16.mxu0 (!%p224_p3), %vm788_vm1, %v787_v0  ;;  %v789_v4 = vmov (!%p224_p3), -1e+30   ;;  %vm402_vm3 = vcmask (!%p224_p3), 130048   ;;  %v790_v11 = vmov (!%p224_p3), 0   ;;  %vm501_vm4 = vcmask (!%p224_p3), 60416  }
   0xb   : > { %687 = vmatprep.subr.bf16.mxu1 (!%p224_p3), %v787_v0  ;;  %689 = vmatprep.mubr.msk.bf16.mxu1 (!%p224_p3), %vm788_vm1, %v787_v0  ;;  %341 = vst.msk [vmem:[#allocation2] sm:$0xff] (!%p224_p3), %vm340_vm2, %v789_v4  ;;  %342 = vst.msk [vmem:[#allocation3] sm:$0xff] (!%p224_p3), %vm340_vm2, %v787_v0 }
   0xc   : > { %737 = vset.pattern.permute.xlu0 (!%p224_p3), %v790_v11  ;;  %738 = vset.pattern.permute.xlu1 (!%p224_p3), %v790_v11 }
  0x10   : > { %s908_s13 = smov (!%p285_p5, %s773_s13), 1  ;;  %s910_s12 = smov (!%p287_p6, %s769_s12), 3 }
  0x11   : > { %s664_s19 = sshll.u32 %s908_s13, 3  ;;  %s661_s20 = sshll.u32 %s908_s13, 2  ;;  %v426_v31 = vld [vmem:[#allocation4] sm:$0xff] }
  0x12   : > { %s663_s21 = sshll.u32 %s910_s12, 1  ;;  %s845_s24 = sadd.s32 %s661_s20, %s910_s12  ;;  %v401_v12 = vld [vmem:[#allocation2] sm:$0xff]  ;;  %v418_v25 = vld [vmem:[#allocation3] sm:$0xff] }
  0x13   : > { %s842_s22 = sadd.s32 %s664_s19, %s663_s21  ;;  %s662_s28 = sshll.u32 %s845_s24, 2 }
  0x14   : > { %s665_s23 = sshll.u32 %s842_s22, 2  ;;  %s295_s4 = scalar_lea.vmem %s893_s0, %s662_s28 }
  0x15   : > { %s308_s27 = scalar_lea.vmem %s894_s1, %s665_s23  ;;  %v345_v3 = vld [vmem:[%s295_s4] sm:$0xf]  ;;  %s322_s7 = scalar_lea.vmem %s895_s2, %s665_s23 }
  0x16   : > { %v739_v1 = vld [vmem:[%s308_s27] sm:$0xff]   ;;  %s334_s10 = scalar_lea.vmem %s896_s3, %s662_s28 }
  0x17   : > { %v358_v2 = vsel %vm343_vm0, %v739_v1, 0  ;;  %v740_v16 = vld [vmem:[%s322_s7] sm:$0xff]  }
  0x18   : > { %682 = vmatpush3.bf16.xpose.msra.mxu0 %v358_v2  ;;  %688 = vmatpush3.bf16.msra.mxu1 %v740_v16 }
  0x1f   : > { %684 = vmatmul.mubr.msk.bf16.vlgmr.msra.gmra.mrb[0].mxu0 %vm343_vm0, %v345_v3 }
  0xf2   : > { %v394_v5 = vpop.f32.mrb[0].mxu0 }
  0xf3   : > { %v400_v6 = vmul.f32 0.35355338, %v394_v5  ;;  %v685_v7 = vpop.f32.mrb[1].mxu0 }
  0xf4   : > { %v397_v8 = vpop.f32.mrb[2].mxu0 }
  0xf5   : > { %v686_v9 = vpop.f32.mrb[3].mxu0  ;;  %v403_v10 = vsel %vm402_vm3, %v400_v6, -inf }
  0xf6   : > { %404 = vmax.xlane.f32.xlu0 %v403_v10 }
 0x183   : > { %v405_v13 = vpop.xlane.xlu0 %404 }
 0x184   : > { %v406_v14 = vmax.f32 %v401_v12, %v405_v13 }
 0x186   : > { %v407_v15 = vsub.f32 %v401_v12, %v406_v14  ;;  %487 = vst.msk [vmem:[#allocation2] sm:$0xff] %vm340_vm2, %v406_v14  ;;  %412 = vperm.xlu0 %737, %v406_v14  }
 0x188   : > { %v408_v23 = vmul.f32 1.442695, %v407_v15 }
 0x205   : > { %v413_v17 = vpop.permute.xlu0 %412 }
 0x206   : > { %v415_v18 = vsub.f32 %v400_v6, %v413_v17 }
 0x208   : > { %v416_v19 = vmul.f32 1.442695, %v415_v18 }
 0x20a   : > { %741 = vpow2.f32 %v416_v19 }
 0x20b   : > { %743 = vpow2.f32 %v408_v23 }
 0x214   : > { %v742_v20 = vpop.eup %741 }
 0x215   : > { %v420_v21 = vsel %vm402_vm3, %v742_v20, 0.0  ;;  %v433_v22 = vpack.c.bf16 %v742_v20, %v742_v20  ;;  %v744_v24 = vpop.eup %743 }
 0x216   : > { %421 = vadd.xlane.f32.xlu1 %v420_v21  ;;  %v419_v26 = vmul.f32 %v744_v24, %v418_v25 }
 0x217   : > { %690 = vmatmul.mubr.msk.bf16.vlgmr.msra.gmra.mrb[0].mxu1 %vm402_vm3, %v433_v22 }
 0x227   : > { %429 = vperm.xlu1 %738, %v744_v24  }
 0x2a3   : > { %v422_v27 = vpop.xlane.xlu1 %421 }
 0x2a4   : > { %v423_v28 = vadd.f32 %v422_v27, %v419_v26 }
 0x2a6   : > { %425 = vst.msk [vmem:[#allocation3] sm:$0xff] %vm340_vm2, %v423_v28 }
 0x2a7   : > { %v430_v32 = vpop.permute.xlu1 %429 }
 0x2a8   : > { %v432_v33 = vmul.f32 %v430_v32, %v426_v31 }
 0x2ad   : > { %v492_v29 = vld [vmem:[#allocation3] sm:$0xff] }
 0x2ae   : > { %745 = vrcp.f32 %v492_v29 }
 0x2b8   : > { %v746_v30 = vpop.eup %745 }
 0x2b9   : > { %496 = vperm.xlu1 %738, %v746_v30  }
 0x2ea   : > { %v479_v34 = vpop.f32.mrb[0].mxu1 }
 0x2eb   : > { %v485_v35 = vadd.f32 %v479_v34, %v432_v33  ;;  %v691_v36 = vpop.f32.mrb[1].mxu1 }
 0x2ec   : > { %v482_v37 = vpop.f32.mrb[2].mxu1 }
 0x2ed   : > { %486 = vst.msk [vmem:[#allocation4] sm:$0xff] %vm343_vm0, %v485_v35  ;;  %v692_v38 = vpop.f32.mrb[3].mxu1 }
 0x2f4   : > { %v491_v39 = vld [vmem:[#allocation4] sm:$0xff] }
 0x338   : > { %v497_v40 = vpop.permute.xlu1 %496 }
 0x339   : > { %v499_v41 = vmul.f32 %v497_v40, %v491_v39 }
 0x33b   : > { %v500_v42 = vpack.c.bf16 %v499_v41, %v499_v41 }
 0x33d   : > { %502 = vst.msk [vmem:[%s334_s10] sm:$0xf] %vm501_vm4, %v500_v42 }
 0x33e PF: > { %s13_s16 = sadd.s32 1, %s785_s16   ;;  %s897_s12 = smov %s777_s14 }
 0x33f   : > { %p10_p7 = scmp.ge.s32.totalorder %s13_s16, 10   ;;  %s898_s13 = smov %s781_s15 }
 0x340   : > { %s899_s14 = smov %s902_s17  ;;  %s900_s15 = smov %s906_s18 }
 0x341   :  { %12 = sbr.rel (!%p10_p7) target bundleno = 3 (0x3), region = 76 }

// kernel: _lambda_.34
= control target key start
LH: loop header
LB: loop body
LE: loop exit
PB: predicated region body
PF: predicated region fallthrough
CT: control target
= control target key end

     0   :  { %s861_s26 = smov 0   ;;  %s863_s27 = smov 0   ;;  %s939_s0 = inlined_call_operand.vmem [shape: bf16[16,128], index: 0, kind: input, shape index: {}]   ;;  %s940_s1 = inlined_call_operand.vmem [shape: bf16[128,32], index: 1, kind: input, shape index: {}]   ;;  %s941_s2 = inlined_call_operand.vmem [shape: f32[1,32], index: 2, kind: input, shape index: {}, may-alias: {2,5}]   ;;  %s942_s3 = inlined_call_operand.<no memory space> [shape: f32[1,1], index: 3, kind: input, shape index: {}]   ;;  %s943_s4 = inlined_call_operand.vmem [shape: f32[1,32], index: 4, kind: input, shape index: {}]   ;;  %s944_s5 = inlined_call_operand.vmem [shape: f32[1,32], index: 5, kind: input, shape index: {}, may-alias: {2,5}]   ;;  %s945_s6 = inlined_call_operand.vmem [shape: bf16[16,32], index: 6, kind: input, shape index: {}]   ;;  %s946_s7 = inlined_call_operand.vmem [shape: bf16[16,32], index: 7, kind: output, shape index: {}]  }
   0x1   :  { %12 = sst [smem:[#allocation2]] %s942_s3  ;;  %s865_s28 = smov 0  }
   0x2 LB: > { %s37_s3 = sadd.s32 1, %s810_s27  ;;  %p710_p0 = scmp.ge.s32.totalorder %s814_s28, 1  ;;  %s814_s28 = sphi %s865_s28, %s18_s28   ;;  %s810_s27 = sphi %s863_s27, %s948_s27   ;;  %s806_s26 = sphi %s861_s26, %s947_s26  }
   0x3   : > { %p39_p1 = scmp.ge.s32.totalorder %s37_s3, 2  ;;  %p317_p2 = scmp.lt.s32.totalorder %s814_s28, 3 }
   0x5   : > { %s950_s3 = smov (%p39_p1, %s37_s3), 0  ;;  %p318_p3 = pnand %p710_p0, %p317_p2 }
   0x6   : > { %v782_v0 = vld [vmem:[%s940_s1] sm:$0xff] (!%p318_p3)   ;;  %v816_v1 = vmov (!%p318_p3), 0.0   ;;  %v783_v2 = vld [vmem:[%s940_s1 + $0x8] sm:$0xff] (!%p318_p3)   ;;  %vm817_vm0 = vmmov (!%p318_p3), 0   ;;  %v784_v3 = vld [vmem:[%s940_s1 + $0x10] sm:$0xff] (!%p318_p3)   ;;  %p377_p4 = scmp.lt.s32.totalorder (!%p318_p3), %s806_s26, 1 }
   0x7   : > { %321 = sbr.rel (%p318_p3) target bundleno = 275 (0x113), region = 48  ;;  %736 = vmatprep.subr.bf16.mxu0 (!%p318_p3), %v816_v1  ;;  %752 = vmatprep.mubr.msk.bf16.mxu0 (!%p318_p3), %vm817_vm0, %v816_v1  ;;  %v785_v4 = vld [vmem:[%s940_s1 + $0x18] sm:$0xff] (!%p318_p3)   ;;  %v786_v5 = vld [vmem:[%s940_s1 + $0x20] sm:$0xff] (!%p318_p3)   ;;  %v787_v6 = vld [vmem:[%s940_s1 + $0x28] sm:$0xff] (!%p318_p3)   ;;  %s530_s29 = sld [smem:[#allocation2]] (!%p318_p3)  ;;  %vm553_vm1 = vcmask (!%p318_p3), 257024  }
   0x8   : > { %737 = vmatpush3.bf16.msra.mxu0 (!%p318_p3), %v782_v0  ;;  %v788_v7 = vld [vmem:[%s940_s1 + $0x30] sm:$0xff] (!%p318_p3)   ;;  %v789_v8 = vld [vmem:[%s940_s1 + $0x38] sm:$0xff] (!%p318_p3)   ;;  %v714_v10 = vld [vmem:[%s941_s2] ss:$0 sm:$0xff] (!%p318_p3) }
   0x9   : > { %738 = vmatprep.subr.bf16.mxu0 (!%p318_p3), %v816_v1  ;;  %v723_v19 = vld [vmem:[%s943_s4] ss:$0 sm:$0xff] (!%p318_p3) }
   0xa   : > { %v724_v21 = vld [vmem:[%s944_s5] ss:$0 sm:$0xff] (!%p318_p3) }
   0xc   : > { %739 = vmatpush3.bf16.msra.mxu0 (!%p318_p3), %v783_v2 }
   0xd   : > { %740 = vmatprep.subr.bf16.mxu0 (!%p318_p3), %v816_v1  ;;  %v531_v12 = vstv (!%p318_p3), %s530_s29 }
   0xe   : > { %s952_s26 = smov (!%p377_p4, %s806_s26), 1 }
   0xf   : > { %s904_s20 = sshll.u32 %s952_s26, 2 }
  0x10   : > { %741 = vmatpush3.bf16.msra.mxu0 %v784_v3  ;;  %s383_s25 = scalar_lea.vmem %s939_s0, %s904_s20  ;;  %s408_s10 = scalar_lea.vmem %s945_s6, %s904_s20 }
  0x11   : > { %742 = vmatprep.subr.bf16.mxu0 %v816_v1  ;;  %v417_v9 = vld [vmem:[%s383_s25] sm:$0xf]  ;;  %s415_s17 = scalar_lea.vmem %s946_s7, %s904_s20 }
  0x12   : > { %v549_v18 = vld [vmem:[%s408_s10] sm:$0xf] }
  0x13   : > { %v550_v22 = vunpack.c.l.bf16 %v549_v18 }
  0x14   : > { %743 = vmatpush3.bf16.msra.mxu0 %v785_v4 }
  0x15   : > { %744 = vmatprep.subr.bf16.mxu0 %v816_v1 }
  0x18   : > { %745 = vmatpush3.bf16.msra.mxu0 %v786_v5 }
  0x19   : > { %746 = vmatprep.subr.bf16.mxu0 %v816_v1 }
  0x1c   : > { %747 = vmatpush3.bf16.msra.mxu0 %v787_v6 }
  0x1d   : > { %748 = vmatprep.subr.bf16.mxu0 %v816_v1 }
  0x20   : > { %749 = vmatpush3.bf16.msra.mxu0 %v788_v7 }
  0x21   : > { %750 = vmatprep.subr.bf16.mxu0 %v816_v1 }
  0x24   : > { %751 = vmatpush3.bf16.msra.mxu0 %v789_v8 }
  0x27   : > { %753 = vmatmul.mubr.bf16.vlgmr.msra.gmra.mrb[0].mxu0 %v417_v9 }
  0xfa   : > { %v523_v11 = vpop.f32.mrb[0].mxu0 }
  0xfb   : > { %v524_v13 = vadd.f32 %v714_v10, %v523_v11  ;;  %v754_v14 = vpop.f32.mrb[1].mxu0 }
  0xfc   : > { %v526_v15 = vpop.f32.mrb[2].mxu0 }
  0xfd   : > { %v532_v16 = vmul.f32 %v531_v12, %v524_v13  ;;  %v755_v17 = vpop.f32.mrb[3].mxu0 }
  0xff   : > { %790 = vtanh.f32 %v532_v16 }
 0x109   : > { %v791_v20 = vpop.eup %790 }
 0x10a   : > { %v540_v23 = vmul.f32 %v791_v20, %v723_v19 }
 0x10c   : > { %v548_v24 = vadd.f32 %v724_v21, %v540_v23 }
 0x10e   : > { %v551_v25 = vadd.f32 %v550_v22, %v548_v24 }
 0x110   : > { %v552_v26 = vpack.c.bf16 %v551_v25, %v551_v25 }
 0x112   : > { %554 = vst.msk [vmem:[%s415_s17] sm:$0xf] %vm553_vm1, %v552_v26 }
 0x113 PF: > { %s18_s28 = sadd.s32 1, %s814_s28   ;;  %s947_s26 = smov %s810_s27 }
 0x114   : > { %p15_p5 = scmp.ge.s32.totalorder %s18_s28, 4   ;;  %s948_s27 = smov %s950_s3 }
 0x116   :  { %17 = sbr.rel (!%p15_p5) target bundleno = 2 (0x2), region = 93 }

// kernel: _lambda_.35
= control target key start
LH: loop header
LB: loop body
LE: loop exit
PB: predicated region body
PF: predicated region fallthrough
CT: control target
= control target key end

     0   :  { %s462_s9 = smov 0   ;;  %s464_s10 = smov 0   ;;  %s501_s0 = inlined_call_operand.vmem [shape: bf16[16,32], index: 0, kind: input, shape index: {}]   ;;  %s502_s1 = inlined_call_operand.vmem [shape: bf16[32,128], index: 1, kind: input, shape index: {}]   ;;  %s503_s2 = inlined_call_operand.vmem [shape: f32[16,128], index: 2, kind: output, shape index: {}]  }
   0x1   :  { %s466_s11 = smov 0  }
   0x2 LB: > { %s31_s12 = sadd.s32 1, %s439_s10  ;;  %p374_p0 = scmp.ge.s32.totalorder %s443_s11, 1  ;;  %s443_s11 = sphi %s466_s11, %s12_s11   ;;  %s439_s10 = sphi %s464_s10, %s505_s10   ;;  %s435_s9 = sphi %s462_s9, %s504_s9  }
   0x3   : > { %p33_p1 = scmp.ge.s32.totalorder %s31_s12, 2  ;;  %p153_p2 = scmp.lt.s32.totalorder %s443_s11, 3 }
   0x5   : > { %s507_s12 = smov (%p33_p1, %s31_s12), 0  ;;  %p154_p3 = pnand %p374_p0, %p153_p2 }
   0x6   : > { %v419_v0 = vld [vmem:[%s502_s1] sm:$0xff] (!%p154_p3)   ;;  %v445_v1 = vmov (!%p154_p3), 0.0   ;;  %v420_v2 = vld [vmem:[%s502_s1 + $0x8] sm:$0xff] (!%p154_p3)   ;;  %vm446_vm0 = vmmov (!%p154_p3), 0   ;;  %p187_p4 = scmp.lt.s32.totalorder (!%p154_p3), %s435_s9, 1  ;;  %vm228_vm1 = vcmask (!%p154_p3), 261120  }
   0x7   : > { %157 = sbr.rel (%p154_p3) target bundleno = 233 (0xe9), region = 28  ;;  %385 = vmatprep.subr.bf16.mxu0 (!%p154_p3), %v445_v1  ;;  %389 = vmatprep.mubr.msk.bf16.mxu0 (!%p154_p3), %vm446_vm0, %v445_v1 }
   0x8   : > { %386 = vmatpush3.bf16.msra.mxu0 (!%p154_p3), %v419_v0 }
   0x9   : > { %387 = vmatprep.subr.bf16.mxu0 (!%p154_p3), %v445_v1 }
   0xc   : > { %388 = vmatpush3.bf16.msra.mxu0 (!%p154_p3), %v420_v2 }
   0xe   : > { %s509_s9 = smov (!%p187_p4, %s435_s9), 1 }
   0xf   : > { %s375_s17 = sshll.u32 %s509_s9, 2  ;;  %s376_s21 = sshll.u32 %s509_s9, 3 }
  0x10   : > { %s193_s20 = scalar_lea.vmem %s501_s0, %s375_s17  ;;  %s209_s24 = scalar_lea.vmem %s503_s2, %s376_s21 }
  0x11   : > { %v211_v3 = vld [vmem:[%s193_s20] sm:$0xf] }
  0x12   : > { %390 = vmatmul.mubr.msk.bf16.vlgmr.msra.gmra.mrb[0].mxu0 %vm228_vm1, %v211_v3 }
  0xe5   : > { %v266_v4 = vpop.f32.mrb[0].mxu0 }
  0xe6   : > { %272 = vst [vmem:[%s209_s24] sm:$0xff] %v266_v4  ;;  %v391_v5 = vpop.f32.mrb[1].mxu0 }
  0xe7   : > { %v269_v6 = vpop.f32.mrb[2].mxu0 }
  0xe8   : > { %v392_v7 = vpop.f32.mrb[3].mxu0 }
  0xe9 PF: > { %s12_s11 = sadd.s32 1, %s443_s11   ;;  %s504_s9 = smov %s439_s10 }
  0xea   : > { %p9_p5 = scmp.ge.s32.totalorder %s12_s11, 4   ;;  %s505_s10 = smov %s507_s12 }
  0xec   :  { %11 = sbr.rel (!%p9_p5) target bundleno = 2 (0x2), region = 61 }

</bundles_post_ra>
